<compile_context>
chip_gen: v6e
topology: v6e:2x2x1
jax: 0.10.0
libtpu: 0.0.40
codegen_flags: <defaults>
</compile_context>

<pallas_src>
import functools

import jax
import jax.numpy as jnp
from jax import lax
from jax.experimental import pallas as pl
from jax.experimental.pallas import tpu as pltpu


_ROWS_PER_STEP = 8  # f32 sublane tile -> full (8, 128) output tiles per grid step


def _pad_cols(weight):
    """Pad embedding dim up to a lane multiple (128).  No-op when D % 128 == 0.

    NOTE: in production, pre-pad the table once at parameter-creation time so this
    never runs in the hot path (it materializes an N x Dp copy of the table).
    """
    N, D = weight.shape
    Dp = ((D + 127) // 128) * 128
    if Dp != D:
        weight = jnp.pad(weight, ((0, 0), (0, Dp - D)))
    return weight, D


# ---------------------------------------------------------------------------
# Path 1: general gather (arbitrary indices), 8 rows per grid step.
# ---------------------------------------------------------------------------
def _gather_scale_kernel(idx_ref, w_hbm, out_ref, buf, sem, *, scale, rows):
    """idx_ref: SMEM (S_pad,) i32; w_hbm: HBM (N, Dp) f32; out_ref: (rows, Dp) f32.

    buf: VMEM (2, rows, Dp) double buffer; sem: DMA semaphores (2, rows).
    """
    i = pl.program_id(0)
    n = pl.num_programs(0)
    slot = lax.rem(i, 2)

    def start_fetch(step, slot_):
        # `rows` concurrent single-row gathers: weight[idx[step*rows + r]] -> buf[slot_, r].
        for r in range(rows):  # static unroll
            row = idx_ref[step * rows + r]
            pltpu.make_async_copy(
                w_hbm.at[pl.ds(row, 1), :],
                buf.at[slot_, pl.ds(r, 1), :],
                sem.at[slot_, r],
            ).start()

    # Prime the pipeline on the first step.
    @pl.when(i == 0)
    def _():
        start_fetch(0, slot)

    # Prefetch next step's rows into the other buffer while consuming this one.
    @pl.when(i + 1 < n)
    def _():
        start_fetch(i + 1, 1 - slot)

    # Wait for this step's rows (started at step i-1, or just above when i == 0).
    for r in range(rows):
        pltpu.make_async_copy(
            w_hbm.at[pl.ds(0, 1), :],
            buf.at[slot, pl.ds(r, 1), :],
            sem.at[slot, r],
        ).wait()

    out_ref[...] = buf[slot] * scale


def scaled_embedding_forward(x, weight, scale):
    """General path: out[s] = weight[x[s]] * scale for arbitrary int indices x[S]."""
    S = x.shape[0]
    N, _ = weight.shape
    weight, D = _pad_cols(weight)
    Dp = weight.shape[1]

    R = _ROWS_PER_STEP
    S_pad = ((S + R - 1) // R) * R

    # TODO(synk): PyTorch nn.Embedding raises on out-of-range indices; we clamp instead
    # so a bad index can never drive the row DMA out of bounds.
    idx = jnp.clip(x.astype(jnp.int32), 0, N - 1)
    if S_pad != S:
        idx = jnp.pad(idx, (0, S_pad - S))

    kernel = functools.partial(_gather_scale_kernel, scale=float(scale), rows=R)

    out = pl.pallas_call(
        kernel,
        out_shape=jax.ShapeDtypeStruct((S_pad, Dp), jnp.float32),
        grid_spec=pltpu.PrefetchScalarGridSpec(
            num_scalar_prefetch=1,            # idx lands in SMEM
            grid=(S_pad // R,),
            in_specs=[pl.BlockSpec(memory_space=pl.ANY)],   # table stays in HBM
            out_specs=pl.BlockSpec((R, Dp), lambda i, idx_ref: (i, 0)),
            scratch_shapes=[
                pltpu.VMEM((2, R, Dp), jnp.float32),
                pltpu.SemaphoreType.DMA((2, R)),
            ],
        ),
        # Cross-step manual double-buffering carries state between grid steps, so
        # this axis must stay sequential ("arbitrary"); the contiguous fast path
        # below is the one that gets a megacore "parallel" split on v7x.
        compiler_params=pltpu.CompilerParams(
            dimension_semantics=("arbitrary",),
        ),
        cost_estimate=pl.CostEstimate(
            flops=S_pad * Dp,
            transcendentals=0,
            bytes_accessed=2 * S_pad * Dp * 4 + S_pad * 4,
        ),
    )(idx, weight)

    if S_pad != S or Dp != D:
        out = out[:S, :D]
    return out


# ---------------------------------------------------------------------------
# Path 2: contiguous fast path (x == arange(num_rows), the real demucs usage).
# ---------------------------------------------------------------------------
def _scale_block_kernel(w_ref, out_ref, *, scale):
    out_ref[...] = w_ref[...] * scale


def scaled_embedding_forward_arange(weight, scale, num_rows=None):
    """Fast path for x == arange(num_rows): no gather, stream large weight tiles."""
    N, _ = weight.shape
    S = N if num_rows is None else int(num_rows)
    weight, D = _pad_cols(weight)
    Dp = weight.shape[1]

    TR = min(256, max(8, ((S + 7) // 8) * 8))   # large row tiles; (8,128)-aligned
    grid = (pl.cdiv(S, TR),)

    kernel = functools.partial(_scale_block_kernel, scale=float(scale))
    out = pl.pallas_call(
        kernel,
        out_shape=jax.ShapeDtypeStruct((S, Dp), jnp.float32),
        grid_spec=pltpu.PrefetchScalarGridSpec(
            num_scalar_prefetch=0,
            grid=grid,
            in_specs=[pl.BlockSpec((TR, Dp), lambda i: (i, 0))],
            out_specs=pl.BlockSpec((TR, Dp), lambda i: (i, 0)),
        ),
        compiler_params=pltpu.CompilerParams(
            dimension_semantics=("parallel",),   # independent tiles -> megacore on v7x
        ),
        cost_estimate=pl.CostEstimate(
            flops=S * Dp,
            transcendentals=0,
            bytes_accessed=2 * S * Dp * 4,
        ),
    )(weight)

    if Dp != D:
        out = out[:, :D]
    return out


# ---------------------------------------------------------------------------
# Init mirroring ScaledEmbedding.__init__ (smooth cumsum + weight /= scale).
# ---------------------------------------------------------------------------
def init_scaled_embedding(key, num_embeddings, embedding_dim, scale=10.0, smooth=False):
    w = jax.random.normal(key, (num_embeddings, embedding_dim), jnp.float32)
    if smooth:
        w = jnp.cumsum(w, axis=0)
        w = w / jnp.sqrt(jnp.arange(1, num_embeddings + 1, dtype=jnp.float32))[:, None]
    w = w / scale  # stored weight is divided by scale (boosted-LR trick)
    return w


if __name__ == "__main__":
    num_embeddings = 64
    embedding_dim = 128
    scale = 10.0
    S = 64  # number of lookups (hdemucs: the frequency-axis length)

    key = jax.random.PRNGKey(0)
    k_w, k_x = jax.random.split(key)

    weight = init_scaled_embedding(
        k_w, num_embeddings, embedding_dim, scale=scale, smooth=True
    )

    # --- general gather path: arbitrary indices ---
    x = jax.random.randint(k_x, (S,), 0, num_embeddings, dtype=jnp.int32)
    out = jax.block_until_ready(scaled_embedding_forward(x, weight, scale))
    ref = jnp.take(weight, x, axis=0) * scale
    assert out.shape == (S, embedding_dim)
    assert jnp.allclose(out, ref, atol=1e-5, rtol=1e-5)

    # --- contiguous fast path: x == arange(S) (actual demucs call pattern) ---
    out_c = jax.block_until_ready(scaled_embedding_forward_arange(weight, scale, S))
    ref_c = weight[:S] * scale
    assert out_c.shape == (S, embedding_dim)
    assert jnp.allclose(out_c, ref_c, atol=1e-5, rtol=1e-5)

    print("KERNEL_OK")
</pallas_src>

<mosaic_0001>
module attributes {stable_mosaic.version = 11 : i64} {
  func.func @_gather_scale_kernel(%arg0: i32, %arg1: memref<64xi32, #tpu.memory_space<smem>>, %arg2: memref<64x128xf32, #tpu.memory_space<any>>, %arg3: memref<8x128xf32, #tpu.memory_space<vmem>>, %arg4: memref<2x8x128xf32, #tpu.memory_space<vmem>>, %arg5: memref<2x8x!tpu.dma_semaphore, #tpu.memory_space<semaphore_mem>>) attributes {dimension_semantics = [#tpu.dimension_semantics<arbitrary>], iteration_bounds = array<i64: 8>, scalar_prefetch = 1 : i64, scratch_operands = 2 : i64, tpu.core_type = #tpu.core_type<tc>, window_params = [{}, {transform_indices = @transform_1, window_bounds = array<i64: 8, 128>}]} {
    %c2_i32 = arith.constant 2 : i32
    %0 = arith.remsi %arg0, %c2_i32 : i32
    %c0_i32 = arith.constant 0 : i32
    %1 = arith.cmpi eq, %arg0, %c0_i32 : i32
    %2 = arith.extui %1 : i1 to i32
    %c0_i32_0 = arith.constant 0 : i32
    %3 = arith.cmpi ne, %2, %c0_i32_0 : i32
    scf.if %3 {
      %c0_40 = arith.constant 0 : index
      %54 = memref.load %arg1[%c0_40] : memref<64xi32, #tpu.memory_space<smem>>
      %c0_i32_41 = arith.constant 0 : i32
      %c0_i32_42 = arith.constant 0 : i32
      %55 = tpu.memref_slice %arg2[%54, %c0_i32_42] : memref<64x128xf32, #tpu.memory_space<any>> -> memref<1x128xf32, #tpu.memory_space<any>>
      %c0_i32_43 = arith.constant 0 : i32
      %c0_i32_44 = arith.constant 0 : i32
      %56 = tpu.memref_slice %arg4[%0, %c0_i32_43, %c0_i32_44] : memref<2x8x128xf32, #tpu.memory_space<vmem>> -> memref<1x1x128xf32, #tpu.memory_space<vmem>>
      %57 = tpu.memref_squeeze %56 : memref<1x1x128xf32, #tpu.memory_space<vmem>> -> memref<1x128xf32, #tpu.memory_space<vmem>>
      %58 = tpu.memref_slice %arg5[%0, %c0_i32_41] : memref<2x8x!tpu.dma_semaphore, #tpu.memory_space<semaphore_mem>> -> memref<1x1x!tpu.dma_semaphore, #tpu.memory_space<semaphore_mem>>
      %59 = tpu.memref_squeeze %58 : memref<1x1x!tpu.dma_semaphore, #tpu.memory_space<semaphore_mem>> -> memref<!tpu.dma_semaphore, #tpu.memory_space<semaphore_mem>>
      tpu.enqueue_dma source(%55 : memref<1x128xf32, #tpu.memory_space<any>>) target(%57 : memref<1x128xf32, #tpu.memory_space<vmem>>) target_semaphore(%59 : memref<!tpu.dma_semaphore, #tpu.memory_space<semaphore_mem>>)
      %c1 = arith.constant 1 : index
      %60 = memref.load %arg1[%c1] : memref<64xi32, #tpu.memory_space<smem>>
      %c1_i32_45 = arith.constant 1 : i32
      %c0_i32_46 = arith.constant 0 : i32
      %61 = tpu.memref_slice %arg2[%60, %c0_i32_46] : memref<64x128xf32, #tpu.memory_space<any>> -> memref<1x128xf32, #tpu.memory_space<any>>
      %c1_i32_47 = arith.constant 1 : i32
      %c0_i32_48 = arith.constant 0 : i32
      %62 = tpu.memref_slice %arg4[%0, %c1_i32_47, %c0_i32_48] : memref<2x8x128xf32, #tpu.memory_space<vmem>> -> memref<1x1x128xf32, #tpu.memory_space<vmem>>
      %63 = tpu.memref_squeeze %62 : memref<1x1x128xf32, #tpu.memory_space<vmem>> -> memref<1x128xf32, #tpu.memory_space<vmem>>
      %64 = tpu.memref_slice %arg5[%0, %c1_i32_45] : memref<2x8x!tpu.dma_semaphore, #tpu.memory_space<semaphore_mem>> -> memref<1x1x!tpu.dma_semaphore, #tpu.memory_space<semaphore_mem>>
      %65 = tpu.memref_squeeze %64 : memref<1x1x!tpu.dma_semaphore, #tpu.memory_space<semaphore_mem>> -> memref<!tpu.dma_semaphore, #tpu.memory_space<semaphore_mem>>
      tpu.enqueue_dma source(%61 : memref<1x128xf32, #tpu.memory_space<any>>) target(%63 : memref<1x128xf32, #tpu.memory_space<vmem>>) target_semaphore(%65 : memref<!tpu.dma_semaphore, #tpu.memory_space<semaphore_mem>>)
      %c2 = arith.constant 2 : index
      %66 = memref.load %arg1[%c2] : memref<64xi32, #tpu.memory_space<smem>>
      %c2_i32_49 = arith.constant 2 : i32
      %c0_i32_50 = arith.constant 0 : i32
      %67 = tpu.memref_slice %arg2[%66, %c0_i32_50] : memref<64x128xf32, #tpu.memory_space<any>> -> memref<1x128xf32, #tpu.memory_space<any>>
      %c2_i32_51 = arith.constant 2 : i32
      %c0_i32_52 = arith.constant 0 : i32
      %68 = tpu.memref_slice %arg4[%0, %c2_i32_51, %c0_i32_52] : memref<2x8x128xf32, #tpu.memory_space<vmem>> -> memref<1x1x128xf32, #tpu.memory_space<vmem>>
      %69 = tpu.memref_squeeze %68 : memref<1x1x128xf32, #tpu.memory_space<vmem>> -> memref<1x128xf32, #tpu.memory_space<vmem>>
      %70 = tpu.memref_slice %arg5[%0, %c2_i32_49] : memref<2x8x!tpu.dma_semaphore, #tpu.memory_space<semaphore_mem>> -> memref<1x1x!tpu.dma_semaphore, #tpu.memory_space<semaphore_mem>>
      %71 = tpu.memref_squeeze %70 : memref<1x1x!tpu.dma_semaphore, #tpu.memory_space<semaphore_mem>> -> memref<!tpu.dma_semaphore, #tpu.memory_space<semaphore_mem>>
      tpu.enqueue_dma source(%67 : memref<1x128xf32, #tpu.memory_space<any>>) target(%69 : memref<1x128xf32, #tpu.memory_space<vmem>>) target_semaphore(%71 : memref<!tpu.dma_semaphore, #tpu.memory_space<semaphore_mem>>)
      %c3 = arith.constant 3 : index
      %72 = memref.load %arg1[%c3] : memref<64xi32, #tpu.memory_space<smem>>
      %c3_i32_53 = arith.constant 3 : i32
      %c0_i32_54 = arith.constant 0 : i32
      %73 = tpu.memref_slice %arg2[%72, %c0_i32_54] : memref<64x128xf32, #tpu.memory_space<any>> -> memref<1x128xf32, #tpu.memory_space<any>>
      %c3_i32_55 = arith.constant 3 : i32
      %c0_i32_56 = arith.constant 0 : i32
      %74 = tpu.memref_slice %arg4[%0, %c3_i32_55, %c0_i32_56] : memref<2x8x128xf32, #tpu.memory_space<vmem>> -> memref<1x1x128xf32, #tpu.memory_space<vmem>>
      %75 = tpu.memref_squeeze %74 : memref<1x1x128xf32, #tpu.memory_space<vmem>> -> memref<1x128xf32, #tpu.memory_space<vmem>>
      %76 = tpu.memref_slice %arg5[%0, %c3_i32_53] : memref<2x8x!tpu.dma_semaphore, #tpu.memory_space<semaphore_mem>> -> memref<1x1x!tpu.dma_semaphore, #tpu.memory_space<semaphore_mem>>
      %77 = tpu.memref_squeeze %76 : memref<1x1x!tpu.dma_semaphore, #tpu.memory_space<semaphore_mem>> -> memref<!tpu.dma_semaphore, #tpu.memory_space<semaphore_mem>>
      tpu.enqueue_dma source(%73 : memref<1x128xf32, #tpu.memory_space<any>>) target(%75 : memref<1x128xf32, #tpu.memory_space<vmem>>) target_semaphore(%77 : memref<!tpu.dma_semaphore, #tpu.memory_space<semaphore_mem>>)
      %c4 = arith.constant 4 : index
      %78 = memref.load %arg1[%c4] : memref<64xi32, #tpu.memory_space<smem>>
      %c4_i32_57 = arith.constant 4 : i32
      %c0_i32_58 = arith.constant 0 : i32
      %79 = tpu.memref_slice %arg2[%78, %c0_i32_58] : memref<64x128xf32, #tpu.memory_space<any>> -> memref<1x128xf32, #tpu.memory_space<any>>
      %c4_i32_59 = arith.constant 4 : i32
      %c0_i32_60 = arith.constant 0 : i32
      %80 = tpu.memref_slice %arg4[%0, %c4_i32_59, %c0_i32_60] : memref<2x8x128xf32, #tpu.memory_space<vmem>> -> memref<1x1x128xf32, #tpu.memory_space<vmem>>
      %81 = tpu.memref_squeeze %80 : memref<1x1x128xf32, #tpu.memory_space<vmem>> -> memref<1x128xf32, #tpu.memory_space<vmem>>
      %82 = tpu.memref_slice %arg5[%0, %c4_i32_57] : memref<2x8x!tpu.dma_semaphore, #tpu.memory_space<semaphore_mem>> -> memref<1x1x!tpu.dma_semaphore, #tpu.memory_space<semaphore_mem>>
      %83 = tpu.memref_squeeze %82 : memref<1x1x!tpu.dma_semaphore, #tpu.memory_space<semaphore_mem>> -> memref<!tpu.dma_semaphore, #tpu.memory_space<semaphore_mem>>
      tpu.enqueue_dma source(%79 : memref<1x128xf32, #tpu.memory_space<any>>) target(%81 : memref<1x128xf32, #tpu.memory_space<vmem>>) target_semaphore(%83 : memref<!tpu.dma_semaphore, #tpu.memory_space<semaphore_mem>>)
      %c5 = arith.constant 5 : index
      %84 = memref.load %arg1[%c5] : memref<64xi32, #tpu.memory_space<smem>>
      %c5_i32_61 = arith.constant 5 : i32
      %c0_i32_62 = arith.constant 0 : i32
      %85 = tpu.memref_slice %arg2[%84, %c0_i32_62] : memref<64x128xf32, #tpu.memory_space<any>> -> memref<1x128xf32, #tpu.memory_space<any>>
      %c5_i32_63 = arith.constant 5 : i32
      %c0_i32_64 = arith.constant 0 : i32
      %86 = tpu.memref_slice %arg4[%0, %c5_i32_63, %c0_i32_64] : memref<2x8x128xf32, #tpu.memory_space<vmem>> -> memref<1x1x128xf32, #tpu.memory_space<vmem>>
      %87 = tpu.memref_squeeze %86 : memref<1x1x128xf32, #tpu.memory_space<vmem>> -> memref<1x128xf32, #tpu.memory_space<vmem>>
      %88 = tpu.memref_slice %arg5[%0, %c5_i32_61] : memref<2x8x!tpu.dma_semaphore, #tpu.memory_space<semaphore_mem>> -> memref<1x1x!tpu.dma_semaphore, #tpu.memory_space<semaphore_mem>>
      %89 = tpu.memref_squeeze %88 : memref<1x1x!tpu.dma_semaphore, #tpu.memory_space<semaphore_mem>> -> memref<!tpu.dma_semaphore, #tpu.memory_space<semaphore_mem>>
      tpu.enqueue_dma source(%85 : memref<1x128xf32, #tpu.memory_space<any>>) target(%87 : memref<1x128xf32, #tpu.memory_space<vmem>>) target_semaphore(%89 : memref<!tpu.dma_semaphore, #tpu.memory_space<semaphore_mem>>)
      %c6 = arith.constant 6 : index
      %90 = memref.load %arg1[%c6] : memref<64xi32, #tpu.memory_space<smem>>
      %c6_i32_65 = arith.constant 6 : i32
      %c0_i32_66 = arith.constant 0 : i32
      %91 = tpu.memref_slice %arg2[%90, %c0_i32_66] : memref<64x128xf32, #tpu.memory_space<any>> -> memref<1x128xf32, #tpu.memory_space<any>>
      %c6_i32_67 = arith.constant 6 : i32
      %c0_i32_68 = arith.constant 0 : i32
      %92 = tpu.memref_slice %arg4[%0, %c6_i32_67, %c0_i32_68] : memref<2x8x128xf32, #tpu.memory_space<vmem>> -> memref<1x1x128xf32, #tpu.memory_space<vmem>>
      %93 = tpu.memref_squeeze %92 : memref<1x1x128xf32, #tpu.memory_space<vmem>> -> memref<1x128xf32, #tpu.memory_space<vmem>>
      %94 = tpu.memref_slice %arg5[%0, %c6_i32_65] : memref<2x8x!tpu.dma_semaphore, #tpu.memory_space<semaphore_mem>> -> memref<1x1x!tpu.dma_semaphore, #tpu.memory_space<semaphore_mem>>
      %95 = tpu.memref_squeeze %94 : memref<1x1x!tpu.dma_semaphore, #tpu.memory_space<semaphore_mem>> -> memref<!tpu.dma_semaphore, #tpu.memory_space<semaphore_mem>>
      tpu.enqueue_dma source(%91 : memref<1x128xf32, #tpu.memory_space<any>>) target(%93 : memref<1x128xf32, #tpu.memory_space<vmem>>) target_semaphore(%95 : memref<!tpu.dma_semaphore, #tpu.memory_space<semaphore_mem>>)
      %c7 = arith.constant 7 : index
      %96 = memref.load %arg1[%c7] : memref<64xi32, #tpu.memory_space<smem>>
      %c7_i32_69 = arith.constant 7 : i32
      %c0_i32_70 = arith.constant 0 : i32
      %97 = tpu.memref_slice %arg2[%96, %c0_i32_70] : memref<64x128xf32, #tpu.memory_space<any>> -> memref<1x128xf32, #tpu.memory_space<any>>
      %c7_i32_71 = arith.constant 7 : i32
      %c0_i32_72 = arith.constant 0 : i32
      %98 = tpu.memref_slice %arg4[%0, %c7_i32_71, %c0_i32_72] : memref<2x8x128xf32, #tpu.memory_space<vmem>> -> memref<1x1x128xf32, #tpu.memory_space<vmem>>
      %99 = tpu.memref_squeeze %98 : memref<1x1x128xf32, #tpu.memory_space<vmem>> -> memref<1x128xf32, #tpu.memory_space<vmem>>
      %100 = tpu.memref_slice %arg5[%0, %c7_i32_69] : memref<2x8x!tpu.dma_semaphore, #tpu.memory_space<semaphore_mem>> -> memref<1x1x!tpu.dma_semaphore, #tpu.memory_space<semaphore_mem>>
      %101 = tpu.memref_squeeze %100 : memref<1x1x!tpu.dma_semaphore, #tpu.memory_space<semaphore_mem>> -> memref<!tpu.dma_semaphore, #tpu.memory_space<semaphore_mem>>
      tpu.enqueue_dma source(%97 : memref<1x128xf32, #tpu.memory_space<any>>) target(%99 : memref<1x128xf32, #tpu.memory_space<vmem>>) target_semaphore(%101 : memref<!tpu.dma_semaphore, #tpu.memory_space<semaphore_mem>>)
    } else {
    }
    %c1_i32 = arith.constant 1 : i32
    %4 = arith.addi %arg0, %c1_i32 : i32
    %c8_i32 = arith.constant 8 : i32
    %5 = arith.cmpi slt, %4, %c8_i32 : i32
    %6 = arith.extui %5 : i1 to i32
    %c0_i32_1 = arith.constant 0 : i32
    %7 = arith.cmpi ne, %6, %c0_i32_1 : i32
    scf.if %7 {
      %c1_i32_40 = arith.constant 1 : i32
      %54 = arith.addi %arg0, %c1_i32_40 : i32
      %c1_i32_41 = arith.constant 1 : i32
      %55 = arith.subi %c1_i32_41, %0 : i32
      %c8_i32_42 = arith.constant 8 : i32
      %56 = arith.muli %54, %c8_i32_42 : i32
      %c0_i32_43 = arith.constant 0 : i32
      %57 = arith.addi %56, %c0_i32_43 : i32
      %58 = arith.index_cast %57 : i32 to index
      %59 = memref.load %arg1[%58] : memref<64xi32, #tpu.memory_space<smem>>
      %c0_i32_44 = arith.constant 0 : i32
      %c0_i32_45 = arith.constant 0 : i32
      %60 = tpu.memref_slice %arg2[%59, %c0_i32_45] : memref<64x128xf32, #tpu.memory_space<any>> -> memref<1x128xf32, #tpu.memory_space<any>>
      %c0_i32_46 = arith.constant 0 : i32
      %c0_i32_47 = arith.constant 0 : i32
      %61 = tpu.memref_slice %arg4[%55, %c0_i32_46, %c0_i32_47] : memref<2x8x128xf32, #tpu.memory_space<vmem>> -> memref<1x1x128xf32, #tpu.memory_space<vmem>>
      %62 = tpu.memref_squeeze %61 : memref<1x1x128xf32, #tpu.memory_space<vmem>> -> memref<1x128xf32, #tpu.memory_space<vmem>>
      %63 = tpu.memref_slice %arg5[%55, %c0_i32_44] : memref<2x8x!tpu.dma_semaphore, #tpu.memory_space<semaphore_mem>> -> memref<1x1x!tpu.dma_semaphore, #tpu.memory_space<semaphore_mem>>
      %64 = tpu.memref_squeeze %63 : memref<1x1x!tpu.dma_semaphore, #tpu.memory_space<semaphore_mem>> -> memref<!tpu.dma_semaphore, #tpu.memory_space<semaphore_mem>>
      tpu.enqueue_dma source(%60 : memref<1x128xf32, #tpu.memory_space<any>>) target(%62 : memref<1x128xf32, #tpu.memory_space<vmem>>) target_semaphore(%64 : memref<!tpu.dma_semaphore, #tpu.memory_space<semaphore_mem>>)
      %c8_i32_48 = arith.constant 8 : i32
      %65 = arith.muli %54, %c8_i32_48 : i32
      %c1_i32_49 = arith.constant 1 : i32
      %66 = arith.addi %65, %c1_i32_49 : i32
      %67 = arith.index_cast %66 : i32 to index
      %68 = memref.load %arg1[%67] : memref<64xi32, #tpu.memory_space<smem>>
      %c1_i32_50 = arith.constant 1 : i32
      %c0_i32_51 = arith.constant 0 : i32
      %69 = tpu.memref_slice %arg2[%68, %c0_i32_51] : memref<64x128xf32, #tpu.memory_space<any>> -> memref<1x128xf32, #tpu.memory_space<any>>
      %c1_i32_52 = arith.constant 1 : i32
      %c0_i32_53 = arith.constant 0 : i32
      %70 = tpu.memref_slice %arg4[%55, %c1_i32_52, %c0_i32_53] : memref<2x8x128xf32, #tpu.memory_space<vmem>> -> memref<1x1x128xf32, #tpu.memory_space<vmem>>
      %71 = tpu.memref_squeeze %70 : memref<1x1x128xf32, #tpu.memory_space<vmem>> -> memref<1x128xf32, #tpu.memory_space<vmem>>
      %72 = tpu.memref_slice %arg5[%55, %c1_i32_50] : memref<2x8x!tpu.dma_semaphore, #tpu.memory_space<semaphore_mem>> -> memref<1x1x!tpu.dma_semaphore, #tpu.memory_space<semaphore_mem>>
      %73 = tpu.memref_squeeze %72 : memref<1x1x!tpu.dma_semaphore, #tpu.memory_space<semaphore_mem>> -> memref<!tpu.dma_semaphore, #tpu.memory_space<semaphore_mem>>
      tpu.enqueue_dma source(%69 : memref<1x128xf32, #tpu.memory_space<any>>) target(%71 : memref<1x128xf32, #tpu.memory_space<vmem>>) target_semaphore(%73 : memref<!tpu.dma_semaphore, #tpu.memory_space<semaphore_mem>>)
      %c8_i32_54 = arith.constant 8 : i32
      %74 = arith.muli %54, %c8_i32_54 : i32
      %c2_i32_55 = arith.constant 2 : i32
      %75 = arith.addi %74, %c2_i32_55 : i32
      %76 = arith.index_cast %75 : i32 to index
      %77 = memref.load %arg1[%76] : memref<64xi32, #tpu.memory_space<smem>>
      %c2_i32_56 = arith.constant 2 : i32
      %c0_i32_57 = arith.constant 0 : i32
      %78 = tpu.memref_slice %arg2[%77, %c0_i32_57] : memref<64x128xf32, #tpu.memory_space<any>> -> memref<1x128xf32, #tpu.memory_space<any>>
      %c2_i32_58 = arith.constant 2 : i32
      %c0_i32_59 = arith.constant 0 : i32
      %79 = tpu.memref_slice %arg4[%55, %c2_i32_58, %c0_i32_59] : memref<2x8x128xf32, #tpu.memory_space<vmem>> -> memref<1x1x128xf32, #tpu.memory_space<vmem>>
      %80 = tpu.memref_squeeze %79 : memref<1x1x128xf32, #tpu.memory_space<vmem>> -> memref<1x128xf32, #tpu.memory_space<vmem>>
      %81 = tpu.memref_slice %arg5[%55, %c2_i32_56] : memref<2x8x!tpu.dma_semaphore, #tpu.memory_space<semaphore_mem>> -> memref<1x1x!tpu.dma_semaphore, #tpu.memory_space<semaphore_mem>>
      %82 = tpu.memref_squeeze %81 : memref<1x1x!tpu.dma_semaphore, #tpu.memory_space<semaphore_mem>> -> memref<!tpu.dma_semaphore, #tpu.memory_space<semaphore_mem>>
      tpu.enqueue_dma source(%78 : memref<1x128xf32, #tpu.memory_space<any>>) target(%80 : memref<1x128xf32, #tpu.memory_space<vmem>>) target_semaphore(%82 : memref<!tpu.dma_semaphore, #tpu.memory_space<semaphore_mem>>)
      %c8_i32_60 = arith.constant 8 : i32
      %83 = arith.muli %54, %c8_i32_60 : i32
      %c3_i32_61 = arith.constant 3 : i32
      %84 = arith.addi %83, %c3_i32_61 : i32
      %85 = arith.index_cast %84 : i32 to index
      %86 = memref.load %arg1[%85] : memref<64xi32, #tpu.memory_space<smem>>
      %c3_i32_62 = arith.constant 3 : i32
      %c0_i32_63 = arith.constant 0 : i32
      %87 = tpu.memref_slice %arg2[%86, %c0_i32_63] : memref<64x128xf32, #tpu.memory_space<any>> -> memref<1x128xf32, #tpu.memory_space<any>>
      %c3_i32_64 = arith.constant 3 : i32
      %c0_i32_65 = arith.constant 0 : i32
      %88 = tpu.memref_slice %arg4[%55, %c3_i32_64, %c0_i32_65] : memref<2x8x128xf32, #tpu.memory_space<vmem>> -> memref<1x1x128xf32, #tpu.memory_space<vmem>>
      %89 = tpu.memref_squeeze %88 : memref<1x1x128xf32, #tpu.memory_space<vmem>> -> memref<1x128xf32, #tpu.memory_space<vmem>>
      %90 = tpu.memref_slice %arg5[%55, %c3_i32_62] : memref<2x8x!tpu.dma_semaphore, #tpu.memory_space<semaphore_mem>> -> memref<1x1x!tpu.dma_semaphore, #tpu.memory_space<semaphore_mem>>
      %91 = tpu.memref_squeeze %90 : memref<1x1x!tpu.dma_semaphore, #tpu.memory_space<semaphore_mem>> -> memref<!tpu.dma_semaphore, #tpu.memory_space<semaphore_mem>>
      tpu.enqueue_dma source(%87 : memref<1x128xf32, #tpu.memory_space<any>>) target(%89 : memref<1x128xf32, #tpu.memory_space<vmem>>) target_semaphore(%91 : memref<!tpu.dma_semaphore, #tpu.memory_space<semaphore_mem>>)
      %c8_i32_66 = arith.constant 8 : i32
      %92 = arith.muli %54, %c8_i32_66 : i32
      %c4_i32_67 = arith.constant 4 : i32
      %93 = arith.addi %92, %c4_i32_67 : i32
      %94 = arith.index_cast %93 : i32 to index
      %95 = memref.load %arg1[%94] : memref<64xi32, #tpu.memory_space<smem>>
      %c4_i32_68 = arith.constant 4 : i32
      %c0_i32_69 = arith.constant 0 : i32
      %96 = tpu.memref_slice %arg2[%95, %c0_i32_69] : memref<64x128xf32, #tpu.memory_space<any>> -> memref<1x128xf32, #tpu.memory_space<any>>
      %c4_i32_70 = arith.constant 4 : i32
      %c0_i32_71 = arith.constant 0 : i32
      %97 = tpu.memref_slice %arg4[%55, %c4_i32_70, %c0_i32_71] : memref<2x8x128xf32, #tpu.memory_space<vmem>> -> memref<1x1x128xf32, #tpu.memory_space<vmem>>
      %98 = tpu.memref_squeeze %97 : memref<1x1x128xf32, #tpu.memory_space<vmem>> -> memref<1x128xf32, #tpu.memory_space<vmem>>
      %99 = tpu.memref_slice %arg5[%55, %c4_i32_68] : memref<2x8x!tpu.dma_semaphore, #tpu.memory_space<semaphore_mem>> -> memref<1x1x!tpu.dma_semaphore, #tpu.memory_space<semaphore_mem>>
      %100 = tpu.memref_squeeze %99 : memref<1x1x!tpu.dma_semaphore, #tpu.memory_space<semaphore_mem>> -> memref<!tpu.dma_semaphore, #tpu.memory_space<semaphore_mem>>
      tpu.enqueue_dma source(%96 : memref<1x128xf32, #tpu.memory_space<any>>) target(%98 : memref<1x128xf32, #tpu.memory_space<vmem>>) target_semaphore(%100 : memref<!tpu.dma_semaphore, #tpu.memory_space<semaphore_mem>>)
      %c8_i32_72 = arith.constant 8 : i32
      %101 = arith.muli %54, %c8_i32_72 : i32
      %c5_i32_73 = arith.constant 5 : i32
      %102 = arith.addi %101, %c5_i32_73 : i32
      %103 = arith.index_cast %102 : i32 to index
      %104 = memref.load %arg1[%103] : memref<64xi32, #tpu.memory_space<smem>>
      %c5_i32_74 = arith.constant 5 : i32
      %c0_i32_75 = arith.constant 0 : i32
      %105 = tpu.memref_slice %arg2[%104, %c0_i32_75] : memref<64x128xf32, #tpu.memory_space<any>> -> memref<1x128xf32, #tpu.memory_space<any>>
      %c5_i32_76 = arith.constant 5 : i32
      %c0_i32_77 = arith.constant 0 : i32
      %106 = tpu.memref_slice %arg4[%55, %c5_i32_76, %c0_i32_77] : memref<2x8x128xf32, #tpu.memory_space<vmem>> -> memref<1x1x128xf32, #tpu.memory_space<vmem>>
      %107 = tpu.memref_squeeze %106 : memref<1x1x128xf32, #tpu.memory_space<vmem>> -> memref<1x128xf32, #tpu.memory_space<vmem>>
      %108 = tpu.memref_slice %arg5[%55, %c5_i32_74] : memref<2x8x!tpu.dma_semaphore, #tpu.memory_space<semaphore_mem>> -> memref<1x1x!tpu.dma_semaphore, #tpu.memory_space<semaphore_mem>>
      %109 = tpu.memref_squeeze %108 : memref<1x1x!tpu.dma_semaphore, #tpu.memory_space<semaphore_mem>> -> memref<!tpu.dma_semaphore, #tpu.memory_space<semaphore_mem>>
      tpu.enqueue_dma source(%105 : memref<1x128xf32, #tpu.memory_space<any>>) target(%107 : memref<1x128xf32, #tpu.memory_space<vmem>>) target_semaphore(%109 : memref<!tpu.dma_semaphore, #tpu.memory_space<semaphore_mem>>)
      %c8_i32_78 = arith.constant 8 : i32
      %110 = arith.muli %54, %c8_i32_78 : i32
      %c6_i32_79 = arith.constant 6 : i32
      %111 = arith.addi %110, %c6_i32_79 : i32
      %112 = arith.index_cast %111 : i32 to index
      %113 = memref.load %arg1[%112] : memref<64xi32, #tpu.memory_space<smem>>
      %c6_i32_80 = arith.constant 6 : i32
      %c0_i32_81 = arith.constant 0 : i32
      %114 = tpu.memref_slice %arg2[%113, %c0_i32_81] : memref<64x128xf32, #tpu.memory_space<any>> -> memref<1x128xf32, #tpu.memory_space<any>>
      %c6_i32_82 = arith.constant 6 : i32
      %c0_i32_83 = arith.constant 0 : i32
      %115 = tpu.memref_slice %arg4[%55, %c6_i32_82, %c0_i32_83] : memref<2x8x128xf32, #tpu.memory_space<vmem>> -> memref<1x1x128xf32, #tpu.memory_space<vmem>>
      %116 = tpu.memref_squeeze %115 : memref<1x1x128xf32, #tpu.memory_space<vmem>> -> memref<1x128xf32, #tpu.memory_space<vmem>>
      %117 = tpu.memref_slice %arg5[%55, %c6_i32_80] : memref<2x8x!tpu.dma_semaphore, #tpu.memory_space<semaphore_mem>> -> memref<1x1x!tpu.dma_semaphore, #tpu.memory_space<semaphore_mem>>
      %118 = tpu.memref_squeeze %117 : memref<1x1x!tpu.dma_semaphore, #tpu.memory_space<semaphore_mem>> -> memref<!tpu.dma_semaphore, #tpu.memory_space<semaphore_mem>>
      tpu.enqueue_dma source(%114 : memref<1x128xf32, #tpu.memory_space<any>>) target(%116 : memref<1x128xf32, #tpu.memory_space<vmem>>) target_semaphore(%118 : memref<!tpu.dma_semaphore, #tpu.memory_space<semaphore_mem>>)
      %c8_i32_84 = arith.constant 8 : i32
      %119 = arith.muli %54, %c8_i32_84 : i32
      %c7_i32_85 = arith.constant 7 : i32
      %120 = arith.addi %119, %c7_i32_85 : i32
      %121 = arith.index_cast %120 : i32 to index
      %122 = memref.load %arg1[%121] : memref<64xi32, #tpu.memory_space<smem>>
      %c7_i32_86 = arith.constant 7 : i32
      %c0_i32_87 = arith.constant 0 : i32
      %123 = tpu.memref_slice %arg2[%122, %c0_i32_87] : memref<64x128xf32, #tpu.memory_space<any>> -> memref<1x128xf32, #tpu.memory_space<any>>
      %c7_i32_88 = arith.constant 7 : i32
      %c0_i32_89 = arith.constant 0 : i32
      %124 = tpu.memref_slice %arg4[%55, %c7_i32_88, %c0_i32_89] : memref<2x8x128xf32, #tpu.memory_space<vmem>> -> memref<1x1x128xf32, #tpu.memory_space<vmem>>
      %125 = tpu.memref_squeeze %124 : memref<1x1x128xf32, #tpu.memory_space<vmem>> -> memref<1x128xf32, #tpu.memory_space<vmem>>
      %126 = tpu.memref_slice %arg5[%55, %c7_i32_86] : memref<2x8x!tpu.dma_semaphore, #tpu.memory_space<semaphore_mem>> -> memref<1x1x!tpu.dma_semaphore, #tpu.memory_space<semaphore_mem>>
      %127 = tpu.memref_squeeze %126 : memref<1x1x!tpu.dma_semaphore, #tpu.memory_space<semaphore_mem>> -> memref<!tpu.dma_semaphore, #tpu.memory_space<semaphore_mem>>
      tpu.enqueue_dma source(%123 : memref<1x128xf32, #tpu.memory_space<any>>) target(%125 : memref<1x128xf32, #tpu.memory_space<vmem>>) target_semaphore(%127 : memref<!tpu.dma_semaphore, #tpu.memory_space<semaphore_mem>>)
    } else {
    }
    %c0_i32_2 = arith.constant 0 : i32
    %c0_i32_3 = arith.constant 0 : i32
    %c0_i32_4 = arith.constant 0 : i32
    %8 = tpu.memref_slice %arg2[%c0_i32_3, %c0_i32_4] : memref<64x128xf32, #tpu.memory_space<any>> -> memref<1x128xf32, #tpu.memory_space<any>>
    %c0_i32_5 = arith.constant 0 : i32
    %c0_i32_6 = arith.constant 0 : i32
    %9 = tpu.memref_slice %arg4[%0, %c0_i32_5, %c0_i32_6] : memref<2x8x128xf32, #tpu.memory_space<vmem>> -> memref<1x1x128xf32, #tpu.memory_space<vmem>>
    %10 = tpu.memref_squeeze %9 : memref<1x1x128xf32, #tpu.memory_space<vmem>> -> memref<1x128xf32, #tpu.memory_space<vmem>>
    %11 = tpu.memref_slice %arg5[%0, %c0_i32_2] : memref<2x8x!tpu.dma_semaphore, #tpu.memory_space<semaphore_mem>> -> memref<1x1x!tpu.dma_semaphore, #tpu.memory_space<semaphore_mem>>
    %12 = tpu.memref_squeeze %11 : memref<1x1x!tpu.dma_semaphore, #tpu.memory_space<semaphore_mem>> -> memref<!tpu.dma_semaphore, #tpu.memory_space<semaphore_mem>>
    tpu.wait_dma2 semaphore(%12 : memref<!tpu.dma_semaphore, #tpu.memory_space<semaphore_mem>>) src(%8 : memref<1x128xf32, #tpu.memory_space<any>>) dst(%10 : memref<1x128xf32, #tpu.memory_space<vmem>>)
    %c1_i32_7 = arith.constant 1 : i32
    %c0_i32_8 = arith.constant 0 : i32
    %c0_i32_9 = arith.constant 0 : i32
    %13 = tpu.memref_slice %arg2[%c0_i32_8, %c0_i32_9] : memref<64x128xf32, #tpu.memory_space<any>> -> memref<1x128xf32, #tpu.memory_space<any>>
    %c1_i32_10 = arith.constant 1 : i32
    %c0_i32_11 = arith.constant 0 : i32
    %14 = tpu.memref_slice %arg4[%0, %c1_i32_10, %c0_i32_11] : memref<2x8x128xf32, #tpu.memory_space<vmem>> -> memref<1x1x128xf32, #tpu.memory_space<vmem>>
    %15 = tpu.memref_squeeze %14 : memref<1x1x128xf32, #tpu.memory_space<vmem>> -> memref<1x128xf32, #tpu.memory_space<vmem>>
    %16 = tpu.memref_slice %arg5[%0, %c1_i32_7] : memref<2x8x!tpu.dma_semaphore, #tpu.memory_space<semaphore_mem>> -> memref<1x1x!tpu.dma_semaphore, #tpu.memory_space<semaphore_mem>>
    %17 = tpu.memref_squeeze %16 : memref<1x1x!tpu.dma_semaphore, #tpu.memory_space<semaphore_mem>> -> memref<!tpu.dma_semaphore, #tpu.memory_space<semaphore_mem>>
    tpu.wait_dma2 semaphore(%17 : memref<!tpu.dma_semaphore, #tpu.memory_space<semaphore_mem>>) src(%13 : memref<1x128xf32, #tpu.memory_space<any>>) dst(%15 : memref<1x128xf32, #tpu.memory_space<vmem>>)
    %c2_i32_12 = arith.constant 2 : i32
    %c0_i32_13 = arith.constant 0 : i32
    %c0_i32_14 = arith.constant 0 : i32
    %18 = tpu.memref_slice %arg2[%c0_i32_13, %c0_i32_14] : memref<64x128xf32, #tpu.memory_space<any>> -> memref<1x128xf32, #tpu.memory_space<any>>
    %c2_i32_15 = arith.constant 2 : i32
    %c0_i32_16 = arith.constant 0 : i32
    %19 = tpu.memref_slice %arg4[%0, %c2_i32_15, %c0_i32_16] : memref<2x8x128xf32, #tpu.memory_space<vmem>> -> memref<1x1x128xf32, #tpu.memory_space<vmem>>
    %20 = tpu.memref_squeeze %19 : memref<1x1x128xf32, #tpu.memory_space<vmem>> -> memref<1x128xf32, #tpu.memory_space<vmem>>
    %21 = tpu.memref_slice %arg5[%0, %c2_i32_12] : memref<2x8x!tpu.dma_semaphore, #tpu.memory_space<semaphore_mem>> -> memref<1x1x!tpu.dma_semaphore, #tpu.memory_space<semaphore_mem>>
    %22 = tpu.memref_squeeze %21 : memref<1x1x!tpu.dma_semaphore, #tpu.memory_space<semaphore_mem>> -> memref<!tpu.dma_semaphore, #tpu.memory_space<semaphore_mem>>
    tpu.wait_dma2 semaphore(%22 : memref<!tpu.dma_semaphore, #tpu.memory_space<semaphore_mem>>) src(%18 : memref<1x128xf32, #tpu.memory_space<any>>) dst(%20 : memref<1x128xf32, #tpu.memory_space<vmem>>)
    %c3_i32 = arith.constant 3 : i32
    %c0_i32_17 = arith.constant 0 : i32
    %c0_i32_18 = arith.constant 0 : i32
    %23 = tpu.memref_slice %arg2[%c0_i32_17, %c0_i32_18] : memref<64x128xf32, #tpu.memory_space<any>> -> memref<1x128xf32, #tpu.memory_space<any>>
    %c3_i32_19 = arith.constant 3 : i32
    %c0_i32_20 = arith.constant 0 : i32
    %24 = tpu.memref_slice %arg4[%0, %c3_i32_19, %c0_i32_20] : memref<2x8x128xf32, #tpu.memory_space<vmem>> -> memref<1x1x128xf32, #tpu.memory_space<vmem>>
    %25 = tpu.memref_squeeze %24 : memref<1x1x128xf32, #tpu.memory_space<vmem>> -> memref<1x128xf32, #tpu.memory_space<vmem>>
    %26 = tpu.memref_slice %arg5[%0, %c3_i32] : memref<2x8x!tpu.dma_semaphore, #tpu.memory_space<semaphore_mem>> -> memref<1x1x!tpu.dma_semaphore, #tpu.memory_space<semaphore_mem>>
    %27 = tpu.memref_squeeze %26 : memref<1x1x!tpu.dma_semaphore, #tpu.memory_space<semaphore_mem>> -> memref<!tpu.dma_semaphore, #tpu.memory_space<semaphore_mem>>
    tpu.wait_dma2 semaphore(%27 : memref<!tpu.dma_semaphore, #tpu.memory_space<semaphore_mem>>) src(%23 : memref<1x128xf32, #tpu.memory_space<any>>) dst(%25 : memref<1x128xf32, #tpu.memory_space<vmem>>)
    %c4_i32 = arith.constant 4 : i32
    %c0_i32_21 = arith.constant 0 : i32
    %c0_i32_22 = arith.constant 0 : i32
    %28 = tpu.memref_slice %arg2[%c0_i32_21, %c0_i32_22] : memref<64x128xf32, #tpu.memory_space<any>> -> memref<1x128xf32, #tpu.memory_space<any>>
    %c4_i32_23 = arith.constant 4 : i32
    %c0_i32_24 = arith.constant 0 : i32
    %29 = tpu.memref_slice %arg4[%0, %c4_i32_23, %c0_i32_24] : memref<2x8x128xf32, #tpu.memory_space<vmem>> -> memref<1x1x128xf32, #tpu.memory_space<vmem>>
    %30 = tpu.memref_squeeze %29 : memref<1x1x128xf32, #tpu.memory_space<vmem>> -> memref<1x128xf32, #tpu.memory_space<vmem>>
    %31 = tpu.memref_slice %arg5[%0, %c4_i32] : memref<2x8x!tpu.dma_semaphore, #tpu.memory_space<semaphore_mem>> -> memref<1x1x!tpu.dma_semaphore, #tpu.memory_space<semaphore_mem>>
    %32 = tpu.memref_squeeze %31 : memref<1x1x!tpu.dma_semaphore, #tpu.memory_space<semaphore_mem>> -> memref<!tpu.dma_semaphore, #tpu.memory_space<semaphore_mem>>
    tpu.wait_dma2 semaphore(%32 : memref<!tpu.dma_semaphore, #tpu.memory_space<semaphore_mem>>) src(%28 : memref<1x128xf32, #tpu.memory_space<any>>) dst(%30 : memref<1x128xf32, #tpu.memory_space<vmem>>)
    %c5_i32 = arith.constant 5 : i32
    %c0_i32_25 = arith.constant 0 : i32
    %c0_i32_26 = arith.constant 0 : i32
    %33 = tpu.memref_slice %arg2[%c0_i32_25, %c0_i32_26] : memref<64x128xf32, #tpu.memory_space<any>> -> memref<1x128xf32, #tpu.memory_space<any>>
    %c5_i32_27 = arith.constant 5 : i32
    %c0_i32_28 = arith.constant 0 : i32
    %34 = tpu.memref_slice %arg4[%0, %c5_i32_27, %c0_i32_28] : memref<2x8x128xf32, #tpu.memory_space<vmem>> -> memref<1x1x128xf32, #tpu.memory_space<vmem>>
    %35 = tpu.memref_squeeze %34 : memref<1x1x128xf32, #tpu.memory_space<vmem>> -> memref<1x128xf32, #tpu.memory_space<vmem>>
    %36 = tpu.memref_slice %arg5[%0, %c5_i32] : memref<2x8x!tpu.dma_semaphore, #tpu.memory_space<semaphore_mem>> -> memref<1x1x!tpu.dma_semaphore, #tpu.memory_space<semaphore_mem>>
    %37 = tpu.memref_squeeze %36 : memref<1x1x!tpu.dma_semaphore, #tpu.memory_space<semaphore_mem>> -> memref<!tpu.dma_semaphore, #tpu.memory_space<semaphore_mem>>
    tpu.wait_dma2 semaphore(%37 : memref<!tpu.dma_semaphore, #tpu.memory_space<semaphore_mem>>) src(%33 : memref<1x128xf32, #tpu.memory_space<any>>) dst(%35 : memref<1x128xf32, #tpu.memory_space<vmem>>)
    %c6_i32 = arith.constant 6 : i32
    %c0_i32_29 = arith.constant 0 : i32
    %c0_i32_30 = arith.constant 0 : i32
    %38 = tpu.memref_slice %arg2[%c0_i32_29, %c0_i32_30] : memref<64x128xf32, #tpu.memory_space<any>> -> memref<1x128xf32, #tpu.memory_space<any>>
    %c6_i32_31 = arith.constant 6 : i32
    %c0_i32_32 = arith.constant 0 : i32
    %39 = tpu.memref_slice %arg4[%0, %c6_i32_31, %c0_i32_32] : memref<2x8x128xf32, #tpu.memory_space<vmem>> -> memref<1x1x128xf32, #tpu.memory_space<vmem>>
    %40 = tpu.memref_squeeze %39 : memref<1x1x128xf32, #tpu.memory_space<vmem>> -> memref<1x128xf32, #tpu.memory_space<vmem>>
    %41 = tpu.memref_slice %arg5[%0, %c6_i32] : memref<2x8x!tpu.dma_semaphore, #tpu.memory_space<semaphore_mem>> -> memref<1x1x!tpu.dma_semaphore, #tpu.memory_space<semaphore_mem>>
    %42 = tpu.memref_squeeze %41 : memref<1x1x!tpu.dma_semaphore, #tpu.memory_space<semaphore_mem>> -> memref<!tpu.dma_semaphore, #tpu.memory_space<semaphore_mem>>
    tpu.wait_dma2 semaphore(%42 : memref<!tpu.dma_semaphore, #tpu.memory_space<semaphore_mem>>) src(%38 : memref<1x128xf32, #tpu.memory_space<any>>) dst(%40 : memref<1x128xf32, #tpu.memory_space<vmem>>)
    %c7_i32 = arith.constant 7 : i32
    %c0_i32_33 = arith.constant 0 : i32
    %c0_i32_34 = arith.constant 0 : i32
    %43 = tpu.memref_slice %arg2[%c0_i32_33, %c0_i32_34] : memref<64x128xf32, #tpu.memory_space<any>> -> memref<1x128xf32, #tpu.memory_space<any>>
    %c7_i32_35 = arith.constant 7 : i32
    %c0_i32_36 = arith.constant 0 : i32
    %44 = tpu.memref_slice %arg4[%0, %c7_i32_35, %c0_i32_36] : memref<2x8x128xf32, #tpu.memory_space<vmem>> -> memref<1x1x128xf32, #tpu.memory_space<vmem>>
    %45 = tpu.memref_squeeze %44 : memref<1x1x128xf32, #tpu.memory_space<vmem>> -> memref<1x128xf32, #tpu.memory_space<vmem>>
    %46 = tpu.memref_slice %arg5[%0, %c7_i32] : memref<2x8x!tpu.dma_semaphore, #tpu.memory_space<semaphore_mem>> -> memref<1x1x!tpu.dma_semaphore, #tpu.memory_space<semaphore_mem>>
    %47 = tpu.memref_squeeze %46 : memref<1x1x!tpu.dma_semaphore, #tpu.memory_space<semaphore_mem>> -> memref<!tpu.dma_semaphore, #tpu.memory_space<semaphore_mem>>
    tpu.wait_dma2 semaphore(%47 : memref<!tpu.dma_semaphore, #tpu.memory_space<semaphore_mem>>) src(%43 : memref<1x128xf32, #tpu.memory_space<any>>) dst(%45 : memref<1x128xf32, #tpu.memory_space<vmem>>)
    %48 = arith.index_cast %0 : i32 to index
    %c0 = arith.constant 0 : index
    %c0_37 = arith.constant 0 : index
    %49 = vector.load %arg4[%48, %c0, %c0_37] : memref<2x8x128xf32, #tpu.memory_space<vmem>>, vector<1x8x128xf32>
    %50 = vector.shape_cast %49 : vector<1x8x128xf32> to vector<8x128xf32>
    %cst = arith.constant 1.000000e+01 : f32
    %51 = vector.broadcast %cst : f32 to vector<8x128xf32>
    %52 = arith.mulf %50, %51 : vector<8x128xf32>
    %c0_38 = arith.constant 0 : index
    %c0_39 = arith.constant 0 : index
    %53 = vector.load %arg3[%c0_38, %c0_39] : memref<8x128xf32, #tpu.memory_space<vmem>>, vector<8x128xf32>
    tpu.vector_store %arg3[%c0_38, %c0_39], %52 {strides = array<i32>} : memref<8x128xf32, #tpu.memory_space<vmem>>, vector<8x128xf32>,
    return
  }
  func.func @transform_1(%arg0: i32, %arg1: memref<64xi32, #tpu.memory_space<smem>>) -> (i32, i32) {
    %c0_i32 = arith.constant 0 : i32
    %c0_i32_0 = arith.constant 0 : i32
    return %arg0, %c0_i32 : i32, i32
  }
}

</mosaic_0001>

<bundles_post_ra>
// kernel: tpu_custom_call.1
= control target key start
LH: loop header
LB: loop body
LE: loop exit
PB: predicated region body
PF: predicated region fallthrough
CT: control target
= control target key end

     0   :  { %s1357_s9 = smov [#allocation5]   ;;  %s1892_s0 = inlined_call_operand.hbm [shape: s32[64], index: 0, kind: input, shape index: {}]   ;;  %s1893_s1 = inlined_call_operand.hbm [shape: f32[64,128], index: 1, kind: input, shape index: {}]   ;;  %s1894_s2 = inlined_call_operand.hbm [shape: f32[64,128], index: 2, kind: output, shape index: {}]  }
   0x1   :  { %1909 = sst [smem:[#allocation69_spill]] %s1894_s2 }
   0x2   :  { %8 = dma.hbm_to_smem %s1892_s0, 16, %s1357_s9, [#allocation4] }
   0x3   :  { %1323 = dma.done.wait [#allocation4], 16 }
   0x4   :  { %1324 = vsyncadd [#allocation4], 4294967280 }
   0x5   :  { %10 = sfence }
   0x6   :  { %11 = vsyncpa [#allocation7], 0 }
   0x7   :  { %13 = vsyncpa [#allocation7 + $0x1], 0  ;;  %s1378_s12 = smov 0   ;;  %s1380_s13 = smov 0  }
   0x8   :  { %s1382_s14 = smov 0  }
   0x9 LB: > { %1910 = sst [smem:[#allocation60_spill]] %s1347_s12  ;;  %s702_s0 = sadd.s32 4294967295, %s1355_s14   ;;  %s1355_s14 = sphi %s1382_s14, %s1975_s14   ;;  %s1351_s13 = sphi %s1380_s13, %s1974_s13   ;;  %s1347_s12 = sphi %s1378_s12, %s1973_s12  }
   0xa   : > { %1911 = sst [smem:[#allocation61_spill]] %s1351_s13  ;;  %s1395_s15 = sadd.s32 1, %s1355_s14  }
   0xb   : > { %1912 = sst [smem:[#allocation62_spill]] %s1355_s14  ;;  %s22_s16 = ssub.s32 %s1355_s14, %s1395_s15 }
   0xc   : > { %s25_s17 = sadd.s32 1, %s1351_s13  ;;  %p23_p0 = scmp.eq.s32.totalorder %s22_s16, 0 }
   0xd   : > { %p703_p1 = scmp.ne.s32.totalorder %s22_s16, 0  ;;  %p29_p2 = scmp.eq.s32.totalorder %s1355_s14, 7 }
   0xe   : > { %p34_p3 = scmp.ne.s32.totalorder %s1351_s13, %s1347_s12  ;;  %p35_p5 = scmp.eq.s32.totalorder %s702_s0, 7 }
   0xf   : > { %s1404_s18 = scalar_select %p23_p0, %s1351_s13, %s25_s17  }
  0x10   : > { %p1406_p4 = por %p703_p1, %p29_p2  ;;  %p1410_p6 = por %p35_p5, %p34_p3 }
  0x11   : > { %1913 = sst [smem:[#allocation63_spill]] %s1404_s18  ;;  %p704_p7 = scmp.ge.s32.totalorder %s1355_s14, 8 }
  0x12   : > { %s1914_s19 = scalar_select %p1406_p4, 1, 0 }
  0x13   : > { %s1916_s20 = scalar_select %p1410_p6, 1, 0 }
  0x14   : > { %1915 = sst [smem:[#allocation64_spill]] %s1914_s19  ;;  %44 = sbr.rel (%p704_p7) target bundleno = 502 (0x1f6), region = 12 }
  0x15   : > { %1917 = sst [smem:[#allocation65_spill]] %s1916_s20 }
  0x19   : > { %s1895_s21 = sand.u32 1, %s1351_s13   ;;  %p52_p8 = scmp.lt.s32.totalorder %s1355_s14, 0 }
  0x1a   : > { %s1419_s22 = sshll.u32 %s1895_s21, 3  ;;  %s53_s23 = ssub.s32 0, %s1355_s14 }
  0x1b   : > { %s706_s24 = smin.u32 %s1355_s14, %s53_s23  ;;  %p833_p9 = scmp.eq.s32.totalorder %s1355_s14, 0 }
  0x1c   : > { %s55_s25 = sand.u32 1, %s706_s24   ;;  %s62_s27 = sld [smem:[#allocation5]] }
  0x1d   : > { %s56_s26 = ssub.s32 0, %s55_s25  ;;  %s1427_s29 = sld [smem:[#allocation5 + $0x1]] }
  0x1e   : > { %s1977_s26 = smov (!%p52_p8, %s56_s26), %s55_s25  ;;  %s1440_s8 = sld [smem:[#allocation5 + $0x2]] }
  0x1f   : > { %s709_s28 = sshll.u32 %s1977_s26, 3  ;;  %s1453_s25 = scalar_lea.hbm %s1893_s1, 1024 }
  0x20   : > { %s1429_s30 = scalar_lea.vmem [#allocation2], %s709_s28  ;;  %s1435_s5 = scalar_lea.sflag [#allocation3], %s709_s28 }
  0x21   : > { %1918 = sst [smem:[#allocation66_spill]] %s1429_s30  ;;  %s75_s3 = sshll.u32 %s1429_s30, 4  ;;  %s1433_s3 = int_to_ptr.vmem [resolvable:$true] %s75_s3 }
  0x22   : > { %s544_s4 = scalar_lea.vmem %s1429_s30, 1 [#allocation2]  ;;  %s1438_s6 = scalar_lea.sflag %s1435_s5, 1 [#allocation3] }
  0x23   : > { %s92_s7 = sshll.u32 %s544_s4, 4  ;;  %s708_s9 = sshll.u32 %s62_s27, 4  ;;  %s1442_s7 = int_to_ptr.vmem [resolvable:$true] %s92_s7 }
  0x24   : > { %s64_s0 = scalar_lea.hbm %s1893_s1, %s708_s9  ;;  %s711_s16 = sshll.u32 %s1427_s29, 4 }
  0x25   : > { %s869_s17 = scalar_lea.hbm %s64_s0, 16  ;;  %p874_p13 = scmp.lt.s32.totalorder %s64_s0, %s1893_s1 }
  0x26   : > { %p870_p10 = scmp.ne.s32.totalorder %s64_s0, %s869_s17  ;;  %p875_p0 = scmp.lt.s32.totalorder %s1453_s25, %s869_s17 }
  0x28   : > { %p871_p11 = pnand %p870_p10, %p833_p9  ;;  %p876_p1 = por %p875_p0, %p874_p13 }
  0x2a   : > { %p872_p12 = pneg %p871_p11 }
  0x2c   : > { %p877_p2 = pnand %p876_p1, %p872_p12 }
  0x2e   : > { %880 = shalt.err (!%p877_p2)  }
  0x2f   : > { %s881_s27 = scalar_lea.vmem %s1433_s3, 16  ;;  %s1358_s29 = smov [#allocation2]  }
  0x30   : > { %p882_p3 = scmp.ne.s32.totalorder %s1433_s3, %s881_s27  ;;  %s885_s9 = sshll.u32 %s1358_s29, 4  ;;  %s1463_s9 = int_to_ptr.vmem [resolvable:$false] %s885_s9 }
  0x31   : > { %s1466_s10 = scalar_lea.vmem %s1463_s9, 256  ;;  %p888_p8 = scmp.lt.s32.totalorder %s1433_s3, %s1463_s9 }
  0x32   : > { %p883_p5 = pnand %p882_p3, %p833_p9  ;;  %p889_p10 = scmp.lt.s32.totalorder %s1466_s10, %s881_s27 }
  0x34   : > { %p884_p7 = pneg %p883_p5  ;;  %p890_p11 = por %p889_p10, %p888_p8 }
  0x36   : > { %p891_p12 = pnand %p890_p11, %p884_p7 }
  0x38   : > { %894 = shalt.err (!%p891_p12)  }
  0x39   : > { %794 = dma.hbm_to_vmem [thread:$0]  (%p833_p9), %s64_s0, 16, %s1433_s3, %s1435_s5 }
  0x3a   : > { %s81_s23 = scalar_lea.hbm %s1893_s1, %s711_s16  ;;  %s552_s24 = scalar_lea.vmem %s1429_s30, 2 [#allocation2] }
  0x3b   : > { %s895_s28 = scalar_lea.hbm %s81_s23, 16  ;;  %p900_p2 = scmp.lt.s32.totalorder %s81_s23, %s1893_s1 }
  0x3c   : > { %p896_p13 = scmp.ne.s32.totalorder %s81_s23, %s895_s28  ;;  %p901_p3 = scmp.lt.s32.totalorder %s1453_s25, %s895_s28 }
  0x3e   : > { %p897_p0 = pnand %p896_p13, %p833_p9  ;;  %p902_p5 = por %p901_p3, %p900_p2 }
  0x40   : > { %p898_p1 = pneg %p897_p0 }
  0x42   : > { %p903_p7 = pnand %p902_p5, %p898_p1 }
  0x44   : > { %906 = shalt.err (!%p903_p7)  }
  0x45   : > { %s907_s3 = scalar_lea.vmem %s1442_s7, 16  ;;  %p914_p12 = scmp.lt.s32.totalorder %s1442_s7, %s1463_s9 }
  0x46   : > { %p908_p8 = scmp.ne.s32.totalorder %s1442_s7, %s907_s3  ;;  %p915_p13 = scmp.lt.s32.totalorder %s1466_s10, %s907_s3 }
  0x48   : > { %p909_p10 = pnand %p908_p8, %p833_p9  ;;  %p916_p0 = por %p915_p13, %p914_p12 }
  0x4a   : > { %p910_p11 = pneg %p909_p10 }
  0x4c   : > { %p917_p6 = pnand %p916_p0, %p910_p11 }
  0x4e   : > { %920 = shalt.err (!%p917_p6)  }
  0x4f   : > { %795 = dma.hbm_to_vmem [thread:$0]  (%p833_p9), %s81_s23, 16, %s1442_s7, %s1438_s6 }
  0x50   : > { %s715_s0 = sshll.u32 %s1440_s8, 4  ;;  %s1498_s16 = scalar_lea.sflag %s1435_s5, 2 [#allocation3] }
  0x51   : > { %s98_s17 = scalar_lea.hbm %s1893_s1, %s715_s0  ;;  %s109_s28 = sshll.u32 %s552_s24, 4  ;;  %s110_s28 = int_to_ptr.vmem [resolvable:$true] %s109_s28 }
  0x52   : > { %s1503_s4 = sld [smem:[#allocation5 + $0x3]]  ;;  %s921_s27 = scalar_lea.hbm %s98_s17, 16 }
  0x53   : > { %p922_p6 = scmp.ne.s32.totalorder %s98_s17, %s921_s27  ;;  %p926_p3 = scmp.lt.s32.totalorder %s98_s17, %s1893_s1 }
  0x54   : > { %p927_p5 = scmp.lt.s32.totalorder %s1453_s25, %s921_s27 }
  0x55   : > { %p923_p1 = pnand %p922_p6, %p833_p9 }
  0x56   : > { %p928_p7 = por %p927_p5, %p926_p3 }
  0x57   : > { %p924_p2 = pneg %p923_p1 }
  0x59   : > { %p929_p8 = pnand %p928_p7, %p924_p2 }
  0x5b   : > { %932 = shalt.err (!%p929_p8)  }
  0x5c   : > { %s933_s7 = scalar_lea.vmem %s110_s28, 16  ;;  %p940_p13 = scmp.lt.s32.totalorder %s110_s28, %s1463_s9 }
  0x5d   : > { %p934_p10 = scmp.ne.s32.totalorder %s110_s28, %s933_s7  ;;  %p941_p0 = scmp.lt.s32.totalorder %s1466_s10, %s933_s7 }
  0x5f   : > { %p935_p11 = pnand %p934_p10, %p833_p9  ;;  %p942_p6 = por %p941_p0, %p940_p13 }
  0x61   : > { %p936_p12 = pneg %p935_p11 }
  0x63   : > { %p943_p1 = pnand %p942_p6, %p936_p12 }
  0x65   : > { %946 = shalt.err (!%p943_p1)  }
  0x66   : > { %796 = dma.hbm_to_vmem [thread:$0]  (%p833_p9), %s98_s17, 16, %s110_s28, %s1498_s16 }
  0x67   : > { %s560_s21 = scalar_lea.vmem %s1429_s30, 3 [#allocation2]  ;;  %s1520_s8 = scalar_lea.sflag %s1435_s5, 3 [#allocation3] }
  0x68   : > { %s126_s23 = sshll.u32 %s560_s21, 4  ;;  %s1522_s24 = sld [smem:[#allocation5 + $0x4]]  ;;  %s127_s23 = int_to_ptr.vmem [resolvable:$true] %s126_s23 }
  0x69   : > { %s568_s0 = scalar_lea.vmem %s1429_s30, 4 [#allocation2]  ;;  %s1526_s29 = scalar_lea.sflag %s1435_s5, 4 [#allocation3] }
  0x6a   : > { %s143_s11 = sshll.u32 %s568_s0, 4  ;;  %s719_s27 = sshll.u32 %s1503_s4, 4  ;;  %s1529_s11 = int_to_ptr.vmem [resolvable:$true] %s143_s11 }
  0x6b   : > { %s115_s18 = scalar_lea.hbm %s1893_s1, %s719_s27  ;;  %s1534_s17 = sld [smem:[#allocation5 + $0x5]] }
  0x6c   : > { %s947_s28 = scalar_lea.hbm %s115_s18, 16  ;;  %p952_p7 = scmp.lt.s32.totalorder %s115_s18, %s1893_s1 }
  0x6d   : > { %p948_p2 = scmp.ne.s32.totalorder %s115_s18, %s947_s28  ;;  %p953_p8 = scmp.lt.s32.totalorder %s1453_s25, %s947_s28 }
  0x6f   : > { %p949_p3 = pnand %p948_p2, %p833_p9  ;;  %p954_p10 = por %p953_p8, %p952_p7 }
  0x71   : > { %p950_p5 = pneg %p949_p3 }
  0x73   : > { %p955_p11 = pnand %p954_p10, %p950_p5 }
  0x75   : > { %958 = shalt.err (!%p955_p11)  }
  0x76   : > { %s959_s4 = scalar_lea.vmem %s127_s23, 16  ;;  %p966_p6 = scmp.lt.s32.totalorder %s127_s23, %s1463_s9 }
  0x77   : > { %p960_p12 = scmp.ne.s32.totalorder %s127_s23, %s959_s4  ;;  %p967_p1 = scmp.lt.s32.totalorder %s1466_s10, %s959_s4 }
  0x79   : > { %p961_p13 = pnand %p960_p12, %p833_p9  ;;  %p968_p2 = por %p967_p1, %p966_p6 }
  0x7b   : > { %p962_p0 = pneg %p961_p13 }
  0x7d   : > { %p969_p3 = pnand %p968_p2, %p962_p0 }
  0x7f   : > { %972 = shalt.err (!%p969_p3)  }
  0x80   : > { %797 = dma.hbm_to_vmem [thread:$0]  (%p833_p9), %s115_s18, 16, %s127_s23, %s1520_s8 }
  0x81   : > { %s723_s20 = sshll.u32 %s1522_s24, 4  ;;  %s576_s0 = scalar_lea.vmem %s1429_s30, 5 [#allocation2] }
  0x82   : > { %s132_s7 = scalar_lea.hbm %s1893_s1, %s723_s20  ;;  %s1555_s28 = scalar_lea.sflag %s1435_s5, 5 [#allocation3] }
  0x83   : > { %s973_s21 = scalar_lea.hbm %s132_s7, 16  ;;  %p978_p10 = scmp.lt.s32.totalorder %s132_s7, %s1893_s1 }
  0x84   : > { %p974_p5 = scmp.ne.s32.totalorder %s132_s7, %s973_s21  ;;  %p979_p11 = scmp.lt.s32.totalorder %s1453_s25, %s973_s21 }
  0x86   : > { %p975_p7 = pnand %p974_p5, %p833_p9  ;;  %p980_p12 = por %p979_p11, %p978_p10 }
  0x88   : > { %p976_p8 = pneg %p975_p7 }
  0x8a   : > { %p981_p13 = pnand %p980_p12, %p976_p8 }
  0x8c   : > { %984 = shalt.err (!%p981_p13)  }
  0x8d   : > { %s985_s18 = scalar_lea.vmem %s1529_s11, 16  ;;  %p992_p2 = scmp.lt.s32.totalorder %s1529_s11, %s1463_s9 }
  0x8e   : > { %p986_p0 = scmp.ne.s32.totalorder %s1529_s11, %s985_s18  ;;  %p993_p3 = scmp.lt.s32.totalorder %s1466_s10, %s985_s18 }
  0x90   : > { %p987_p6 = pnand %p986_p0, %p833_p9  ;;  %p994_p5 = por %p993_p3, %p992_p2 }
  0x92   : > { %p988_p1 = pneg %p987_p6 }
  0x94   : > { %p995_p7 = pnand %p994_p5, %p988_p1 }
  0x96   : > { %998 = shalt.err (!%p995_p7)  }
  0x97   : > { %798 = dma.hbm_to_vmem [thread:$0]  (%p833_p9), %s132_s7, 16, %s1529_s11, %s1526_s29 }
  0x98   : > { %s160_s12 = sshll.u32 %s576_s0, 4  ;;  %s1574_s23 = sld [smem:[#allocation5 + $0x6]]  ;;  %s161_s12 = int_to_ptr.vmem [resolvable:$true] %s160_s12 }
  0x99   : > { %s727_s24 = sshll.u32 %s1534_s17, 4  ;;  %s584_s21 = scalar_lea.vmem %s1429_s30, 6 [#allocation2] }
  0x9a   : > { %s149_s3 = scalar_lea.hbm %s1893_s1, %s727_s24 }
  0x9b   : > { %s999_s4 = scalar_lea.hbm %s149_s3, 16  ;;  %p1004_p12 = scmp.lt.s32.totalorder %s149_s3, %s1893_s1 }
  0x9c   : > { %p1000_p8 = scmp.ne.s32.totalorder %s149_s3, %s999_s4  ;;  %p1005_p13 = scmp.lt.s32.totalorder %s1453_s25, %s999_s4 }
  0x9e   : > { %p1001_p10 = pnand %p1000_p8, %p833_p9  ;;  %p1006_p0 = por %p1005_p13, %p1004_p12 }
  0xa0   : > { %p1002_p11 = pneg %p1001_p10 }
  0xa2   : > { %p1007_p6 = pnand %p1006_p0, %p1002_p11 }
  0xa4   : > { %1010 = shalt.err (!%p1007_p6)  }
  0xa5   : > { %s1011_s11 = scalar_lea.vmem %s161_s12, 16  ;;  %p1018_p5 = scmp.lt.s32.totalorder %s161_s12, %s1463_s9 }
  0xa6   : > { %p1012_p1 = scmp.ne.s32.totalorder %s161_s12, %s1011_s11  ;;  %p1019_p7 = scmp.lt.s32.totalorder %s1466_s10, %s1011_s11 }
  0xa8   : > { %p1013_p2 = pnand %p1012_p1, %p833_p9  ;;  %p1020_p8 = por %p1019_p7, %p1018_p5 }
  0xaa   : > { %p1014_p3 = pneg %p1013_p2 }
  0xac   : > { %p1021_p10 = pnand %p1020_p8, %p1014_p3 }
  0xae   : > { %1024 = shalt.err (!%p1021_p10)  }
  0xaf   : > { %799 = dma.hbm_to_vmem [thread:$0]  (%p833_p9), %s149_s3, 16, %s161_s12, %s1555_s28 }
  0xb0   : > { %s1595_s2 = scalar_lea.sflag %s1435_s5, 6 [#allocation3]  ;;  %s177_s17 = sshll.u32 %s584_s21, 4  ;;  %s178_s17 = int_to_ptr.vmem [resolvable:$true] %s177_s17 }
  0xb1   : > { %1919 = sst [smem:[#allocation67_spill]] %s1595_s2  ;;  %s731_s7 = sshll.u32 %s1574_s23, 4 }
  0xb2   : > { %s1597_s0 = sld [smem:[#allocation5 + $0x7]]  ;;  %s592_s24 = scalar_lea.vmem %s1429_s30, 7 [#allocation2] }
  0xb3   : > { %s166_s4 = scalar_lea.hbm %s1893_s1, %s731_s7  ;;  %s1605_s18 = scalar_lea.sflag %s1435_s5, 7 [#allocation3] }
  0xb4   : > { %1920 = sst [smem:[#allocation68_spill]] %s1605_s18  ;;  %s1025_s11 = scalar_lea.hbm %s166_s4, 16 }
  0xb5   : > { %p1026_p11 = scmp.ne.s32.totalorder %s166_s4, %s1025_s11  ;;  %p1030_p0 = scmp.lt.s32.totalorder %s166_s4, %s1893_s1 }
  0xb6   : > { %p1031_p6 = scmp.lt.s32.totalorder %s1453_s25, %s1025_s11 }
  0xb7   : > { %p1027_p12 = pnand %p1026_p11, %p833_p9 }
  0xb8   : > { %p1032_p1 = por %p1031_p6, %p1030_p0 }
  0xb9   : > { %p1028_p13 = pneg %p1027_p12 }
  0xbb   : > { %p1033_p2 = pnand %p1032_p1, %p1028_p13 }
  0xbd   : > { %1036 = shalt.err (!%p1033_p2)  }
  0xbe   : > { %s1037_s23 = scalar_lea.vmem %s178_s17, 16  ;;  %p1044_p8 = scmp.lt.s32.totalorder %s178_s17, %s1463_s9 }
  0xbf   : > { %p1038_p3 = scmp.ne.s32.totalorder %s178_s17, %s1037_s23  ;;  %p1045_p10 = scmp.lt.s32.totalorder %s1466_s10, %s1037_s23 }
  0xc1   : > { %p1039_p5 = pnand %p1038_p3, %p833_p9  ;;  %p1046_p11 = por %p1045_p10, %p1044_p8 }
  0xc3   : > { %p1040_p7 = pneg %p1039_p5 }
  0xc5   : > { %p1047_p12 = pnand %p1046_p11, %p1040_p7 }
  0xc7   : > { %1050 = shalt.err (!%p1047_p12)  }
  0xc8   : > { %800 = dma.hbm_to_vmem [thread:$0]  (%p833_p9), %s166_s4, 16, %s178_s17, %s1595_s2 }
  0xc9   : > { %s194_s21 = sshll.u32 %s592_s24, 4  ;;  %s203_s7 = ssub.s32 1, %s1977_s26  ;;  %s195_s21 = int_to_ptr.vmem [resolvable:$true] %s194_s21 }
  0xca   : > { %s735_s20 = sshll.u32 %s1597_s0, 4  ;;  %s791_s27 = sshll.u32 %s1355_s14, 3 }
  0xcb   : > { %s183_s3 = scalar_lea.hbm %s1893_s1, %s735_s20  ;;  %s1627_s23 = sadd.s32 8, %s791_s27 }
  0xcc   : > { %s1051_s19 = scalar_lea.hbm %s183_s3, 16  ;;  %p1056_p2 = scmp.lt.s32.totalorder %s183_s3, %s1893_s1 }
  0xcd   : > { %p1052_p0 = scmp.ne.s32.totalorder %s183_s3, %s1051_s19  ;;  %p1057_p3 = scmp.lt.s32.totalorder %s1453_s25, %s1051_s19 }
  0xcf   : > { %p1053_p6 = pnand %p1052_p0, %p833_p9  ;;  %p1058_p5 = por %p1057_p3, %p1056_p2 }
  0xd1   : > { %p1054_p1 = pneg %p1053_p6 }
  0xd3   : > { %p1059_p7 = pnand %p1058_p5, %p1054_p1 }
  0xd5   : > { %1062 = shalt.err (!%p1059_p7)  }
  0xd6   : > { %s1063_s26 = scalar_lea.vmem %s195_s21, 16  ;;  %p1070_p12 = scmp.lt.s32.totalorder %s195_s21, %s1463_s9 }
  0xd7   : > { %p1064_p8 = scmp.ne.s32.totalorder %s195_s21, %s1063_s26  ;;  %p1071_p13 = scmp.lt.s32.totalorder %s1466_s10, %s1063_s26 }
  0xd9   : > { %p1065_p10 = pnand %p1064_p8, %p833_p9  ;;  %p1072_p0 = por %p1071_p13, %p1070_p12 }
  0xdb   : > { %p1066_p11 = pneg %p1065_p10 }
  0xdd   : > { %p1073_p6 = pnand %p1072_p0, %p1066_p11 }
  0xdf   : > { %1076 = shalt.err (!%p1073_p6)  }
  0xe0   : > { %801 = dma.hbm_to_vmem [thread:$0]  (%p833_p9), %s183_s3, 16, %s195_s21, %s1605_s18 }
  0xe1   : > { %p1921_p1 = scmp.lt.s32.totalorder %s1395_s15, 8  ;;  %s741_s30 = sshll.u32 %s203_s7, 3 }
  0xe2   : > { %s222_s0 = sadd.s32 1, %s1627_s23  ;;  %s1648_s24 = scalar_lea.vmem [#allocation2], %s741_s30 }
  0xe3   : > { %s803_s13 = scalar_select %p1921_p1, [#allocation5], [#allocation42] }
  0xe4   : > { %p1922_p2 = pmov %p1921_p1  ;;  %s218_s4 = sshll.u32 %s1648_s24, 4  ;;  %s219_s4 = int_to_ptr.vmem [resolvable:$true] %s218_s4 }
  0xe5   : > { %s606_s20 = scalar_lea.vmem %s1648_s24, 1 [#allocation2]  ;;  %p1923_p13 = pmov %p1921_p1 }
  0xe6   : > { %s804_s19 = scalar_select %p1922_p2, %s1627_s23, 0 }
  0xe7   : > { %s806_s27 = scalar_select %p1923_p13, [#allocation5], [#allocation43] }
  0xe8   : > { %s205_s17 = sld [smem:[%s803_s13 + %s804_s19]]  ;;  %p1924_p3 = pmov %p1921_p1 }
  0xe9   : > { %s236_s21 = sshll.u32 %s606_s20, 4  ;;  %s1661_s13 = scalar_lea.sflag [#allocation3], %s741_s30  ;;  %s237_s21 = int_to_ptr.vmem [resolvable:$true] %s236_s21 }
  0xea   : > { %s1979_s0 = smov (!%p1924_p3, %s222_s0), 0  ;;  %s609_s19 = scalar_lea.sflag %s1661_s13, 1 [#allocation3] }
  0xeb   : > { %s1656_s12 = sld [smem:[%s806_s27 + %s1979_s0]]  ;;  %p1925_p5 = pmov %p1921_p1 }
  0xee   : > { %s740_s11 = sshll.u32 %s205_s17, 4 }
  0xef   : > { %s207_s26 = scalar_lea.hbm %s1893_s1, %s740_s11 }
  0xf0   : > { %s1077_s14 = scalar_lea.hbm %s207_s26, 16  ;;  %p1082_p10 = scmp.lt.s32.totalorder %s207_s26, %s1893_s1 }
  0xf1   : > { %p1078_p9 = scmp.ne.s32.totalorder %s207_s26, %s1077_s14  ;;  %p1083_p11 = scmp.lt.s32.totalorder %s1453_s25, %s1077_s14 }
  0xf3   : > { %p1079_p7 = pnand %p1078_p9, %p1925_p5  ;;  %p1084_p12 = por %p1083_p11, %p1082_p10 }
  0xf5   : > { %p1080_p8 = pneg %p1079_p7 }
  0xf7   : > { %p1085_p0 = pnand %p1084_p12, %p1080_p8 }
  0xf9   : > { %1088 = shalt.err (!%p1085_p0)  }
  0xfa   : > { %s1089_s17 = scalar_lea.vmem %s219_s4, 16  ;;  %p1096_p3 = scmp.lt.s32.totalorder %s219_s4, %s1463_s9 }
  0xfb   : > { %p1090_p6 = scmp.ne.s32.totalorder %s219_s4, %s1089_s17  ;;  %p1097_p4 = scmp.lt.s32.totalorder %s1466_s10, %s1089_s17 }
  0xfd   : > { %p1091_p2 = pnand %p1090_p6, %p1921_p1  ;;  %p1098_p9 = por %p1097_p4, %p1096_p3 }
  0xff   : > { %p1092_p13 = pneg %p1091_p2 }
 0x101   : > { %p1099_p5 = pnand %p1098_p9, %p1092_p13 }
 0x103   : > { %1102 = shalt.err (!%p1099_p5)  }
 0x104   : > { %p1926_p7 = pmov %p1921_p1  ;;  %s240_s14 = sadd.s32 2, %s1627_s23 }
 0x105   : > { %p1927_p8 = pmov %p1921_p1  ;;  %p1928_p10 = pmov %p1921_p1 }
 0x106   : > { %805 = dma.hbm_to_vmem [thread:$0]  (%p1926_p7), %s207_s26, 16, %s219_s4, %s1661_s13 }
 0x107   : > { %s809_s2 = scalar_select %p1927_p8, [#allocation5], [#allocation44] }
 0x108   : > { %s1981_s14 = smov (!%p1928_p10, %s240_s14), 0  ;;  %s742_s18 = sshll.u32 %s1656_s12, 4 }
 0x109   : > { %s614_s30 = scalar_lea.vmem %s1648_s24, 2 [#allocation2]  ;;  %s225_s27 = scalar_lea.hbm %s1893_s1, %s742_s18 }
 0x10a   : > { %s1687_s11 = sld [smem:[%s809_s2 + %s1981_s14]]  ;;  %s1103_s7 = scalar_lea.hbm %s225_s27, 16 }
 0x10b   : > { %p1104_p4 = scmp.ne.s32.totalorder %s225_s27, %s1103_s7  ;;  %p1929_p11 = pmov %p1921_p1 }
 0x10c   : > { %p1108_p6 = scmp.lt.s32.totalorder %s225_s27, %s1893_s1  ;;  %p1109_p1 = scmp.lt.s32.totalorder %s1453_s25, %s1103_s7 }
 0x10d   : > { %p1105_p12 = pnand %p1104_p4, %p1929_p11 }
 0x10e   : > { %p1110_p2 = por %p1109_p1, %p1108_p6 }
 0x10f   : > { %p1106_p0 = pneg %p1105_p12 }
 0x111   : > { %p1111_p13 = pnand %p1110_p2, %p1106_p0 }
 0x113   : > { %1114 = shalt.err (!%p1111_p13)  }
 0x114   : > { %s1115_s12 = scalar_lea.vmem %s237_s21, 16  ;;  %p1930_p9 = pmov %p1926_p7 }
 0x115   : > { %p1116_p3 = scmp.ne.s32.totalorder %s237_s21, %s1115_s12  ;;  %p1122_p8 = scmp.lt.s32.totalorder %s237_s21, %s1463_s9 }
 0x116   : > { %p1123_p10 = scmp.lt.s32.totalorder %s1466_s10, %s1115_s12 }
 0x117   : > { %p1117_p5 = pnand %p1116_p3, %p1930_p9 }
 0x118   : > { %p1124_p4 = por %p1123_p10, %p1122_p8 }
 0x119   : > { %p1118_p7 = pneg %p1117_p5 }
 0x11b   : > { %p1125_p11 = pnand %p1124_p4, %p1118_p7 }
 0x11d   : > { %1128 = shalt.err (!%p1125_p11)  }
 0x11e   : > { %p1931_p12 = pmov %p1930_p9  ;;  %s254_s26 = sshll.u32 %s614_s30, 4  ;;  %s255_s26 = int_to_ptr.vmem [resolvable:$true] %s254_s26 }
 0x11f   : > { %s258_s17 = sadd.s32 3, %s1627_s23  ;;  %s617_s14 = scalar_lea.sflag %s1661_s13, 2 [#allocation3] }
 0x120   : > { %808 = dma.hbm_to_vmem [thread:$0]  (%p1931_p12), %s225_s27, 16, %s237_s21, %s609_s19 }
 0x121   : > { %p1932_p0 = pmov %p1930_p9  ;;  %s745_s18 = sshll.u32 %s1687_s11, 4 }
 0x122   : > { %s622_s0 = scalar_lea.vmem %s1648_s24, 3 [#allocation2]  ;;  %s243_s4 = scalar_lea.hbm %s1893_s1, %s745_s18 }
 0x123   : > { %s812_s2 = scalar_select %p1932_p0, [#allocation5], [#allocation45] }
 0x124   : > { %p1933_p6 = pmov %p1932_p0  ;;  %s1129_s12 = scalar_lea.hbm %s243_s4, 16 }
 0x125   : > { %p1130_p1 = scmp.ne.s32.totalorder %s243_s4, %s1129_s12  ;;  %p1934_p2 = pmov %p1932_p0 }
 0x126   : > { %s1983_s17 = smov (!%p1933_p6, %s258_s17), 0  ;;  %p1134_p9 = scmp.lt.s32.totalorder %s243_s4, %s1893_s1 }
 0x127   : > { %s1714_s3 = sld [smem:[%s812_s2 + %s1983_s17]]  ;;  %p1131_p13 = pnand %p1130_p1, %p1934_p2 }
 0x128   : > { %p1135_p5 = scmp.lt.s32.totalorder %s1453_s25, %s1129_s12 }
 0x129   : > { %p1132_p3 = pneg %p1131_p13 }
 0x12a   : > { %p1136_p7 = por %p1135_p5, %p1134_p9 }
 0x12c   : > { %p1137_p8 = pnand %p1136_p7, %p1132_p3 }
 0x12e   : > { %1140 = shalt.err (!%p1137_p8)  }
 0x12f   : > { %s1141_s30 = scalar_lea.vmem %s255_s26, 16  ;;  %p1935_p4 = pmov %p1932_p0 }
 0x130   : > { %p1142_p10 = scmp.ne.s32.totalorder %s255_s26, %s1141_s30  ;;  %p1148_p0 = scmp.lt.s32.totalorder %s255_s26, %s1463_s9 }
 0x131   : > { %p1149_p6 = scmp.lt.s32.totalorder %s1466_s10, %s1141_s30 }
 0x132   : > { %p1143_p11 = pnand %p1142_p10, %p1935_p4 }
 0x133   : > { %p1150_p1 = por %p1149_p6, %p1148_p0 }
 0x134   : > { %p1144_p12 = pneg %p1143_p11 }
 0x136   : > { %p1151_p2 = pnand %p1150_p1, %p1144_p12 }
 0x138   : > { %1154 = shalt.err (!%p1151_p2)  }
 0x139   : > { %p1936_p13 = pmov %p1935_p4  ;;  %s272_s27 = sshll.u32 %s622_s0, 4  ;;  %s273_s27 = int_to_ptr.vmem [resolvable:$true] %s272_s27 }
 0x13a   : > { %s276_s11 = sadd.s32 4, %s1627_s23  ;;  %s625_s17 = scalar_lea.sflag %s1661_s13, 3 [#allocation3] }
 0x13b   : > { %811 = dma.hbm_to_vmem [thread:$0]  (%p1936_p13), %s243_s4, 16, %s255_s26, %s617_s14 }
 0x13c   : > { %p1937_p3 = pmov %p1935_p4  ;;  %s748_s18 = sshll.u32 %s1714_s3, 4 }
 0x13d   : > { %s630_s20 = scalar_lea.vmem %s1648_s24, 4 [#allocation2]  ;;  %s261_s21 = scalar_lea.hbm %s1893_s1, %s748_s18 }
 0x13e   : > { %s815_s2 = scalar_select %p1937_p3, [#allocation5], [#allocation46] }
 0x13f   : > { %p1938_p9 = pmov %p1937_p3  ;;  %s1155_s30 = scalar_lea.hbm %s261_s21, 16 }
 0x140   : > { %p1156_p5 = scmp.ne.s32.totalorder %s261_s21, %s1155_s30  ;;  %p1939_p7 = pmov %p1937_p3 }
 0x141   : > { %s1985_s11 = smov (!%p1938_p9, %s276_s11), 0  ;;  %p1160_p4 = scmp.lt.s32.totalorder %s261_s21, %s1893_s1 }
 0x142   : > { %s1739_s19 = sld [smem:[%s815_s2 + %s1985_s11]]  ;;  %p1157_p8 = pnand %p1156_p5, %p1939_p7 }
 0x143   : > { %p1161_p11 = scmp.lt.s32.totalorder %s1453_s25, %s1155_s30 }
 0x144   : > { %p1158_p10 = pneg %p1157_p8 }
 0x145   : > { %p1162_p12 = por %p1161_p11, %p1160_p4 }
 0x147   : > { %p1163_p0 = pnand %p1162_p12, %p1158_p10 }
 0x149   : > { %1166 = shalt.err (!%p1163_p0)  }
 0x14a   : > { %s1167_s0 = scalar_lea.vmem %s273_s27, 16  ;;  %p1940_p1 = pmov %p1937_p3 }
 0x14b   : > { %p1168_p6 = scmp.ne.s32.totalorder %s273_s27, %s1167_s0  ;;  %p1174_p3 = scmp.lt.s32.totalorder %s273_s27, %s1463_s9 }
 0x14c   : > { %p1175_p9 = scmp.lt.s32.totalorder %s1466_s10, %s1167_s0 }
 0x14d   : > { %p1169_p2 = pnand %p1168_p6, %p1940_p1 }
 0x14e   : > { %p1176_p5 = por %p1175_p9, %p1174_p3 }
 0x14f   : > { %p1170_p13 = pneg %p1169_p2 }
 0x151   : > { %p1177_p7 = pnand %p1176_p5, %p1170_p13 }
 0x153   : > { %1180 = shalt.err (!%p1177_p7)  }
 0x154   : > { %p1941_p8 = pmov %p1940_p1  ;;  %s290_s4 = sshll.u32 %s630_s20, 4  ;;  %s291_s4 = int_to_ptr.vmem [resolvable:$true] %s290_s4 }
 0x155   : > { %s294_s3 = sadd.s32 5, %s1627_s23  ;;  %s633_s11 = scalar_lea.sflag %s1661_s13, 4 [#allocation3] }
 0x156   : > { %814 = dma.hbm_to_vmem [thread:$0]  (%p1941_p8), %s261_s21, 16, %s273_s27, %s625_s17 }
 0x157   : > { %p1942_p10 = pmov %p1940_p1  ;;  %p1943_p4 = pmov %p1940_p1 }
 0x158   : > { %s751_s18 = sshll.u32 %s1739_s19, 4  ;;  %s638_s7 = scalar_lea.vmem %s1648_s24, 5 [#allocation2] }
 0x159   : > { %s818_s2 = scalar_select %p1942_p10, [#allocation5], [#allocation47] }
 0x15a   : > { %s1987_s3 = smov (!%p1943_p4, %s294_s3), 0  ;;  %s279_s26 = scalar_lea.hbm %s1893_s1, %s751_s18 }
 0x15b   : > { %s1764_s14 = sld [smem:[%s818_s2 + %s1987_s3]]  ;;  %s1181_s0 = scalar_lea.hbm %s279_s26, 16 }
 0x15c   : > { %p1182_p11 = scmp.ne.s32.totalorder %s279_s26, %s1181_s0  ;;  %p1944_p12 = pmov %p1940_p1 }
 0x15d   : > { %p1186_p1 = scmp.lt.s32.totalorder %s279_s26, %s1893_s1  ;;  %p1187_p2 = scmp.lt.s32.totalorder %s1453_s25, %s1181_s0 }
 0x15e   : > { %p1183_p0 = pnand %p1182_p11, %p1944_p12 }
 0x15f   : > { %p1188_p13 = por %p1187_p2, %p1186_p1 }
 0x160   : > { %p1184_p6 = pneg %p1183_p0 }
 0x162   : > { %p1189_p3 = pnand %p1188_p13, %p1184_p6 }
 0x164   : > { %1192 = shalt.err (!%p1189_p3)  }
 0x165   : > { %s1193_s20 = scalar_lea.vmem %s291_s4, 16  ;;  %p1945_p5 = pmov %p1943_p4 }
 0x166   : > { %p1194_p9 = scmp.ne.s32.totalorder %s291_s4, %s1193_s20  ;;  %p1200_p10 = scmp.lt.s32.totalorder %s291_s4, %s1463_s9 }
 0x167   : > { %p1201_p4 = scmp.lt.s32.totalorder %s1466_s10, %s1193_s20 }
 0x168   : > { %p1195_p7 = pnand %p1194_p9, %p1945_p5 }
 0x169   : > { %p1202_p11 = por %p1201_p4, %p1200_p10 }
 0x16a   : > { %p1196_p8 = pneg %p1195_p7 }
 0x16c   : > { %p1203_p12 = pnand %p1202_p11, %p1196_p8 }
 0x16e   : > { %1206 = shalt.err (!%p1203_p12)  }
 0x16f   : > { %p1946_p0 = pmov %p1945_p5  ;;  %s308_s21 = sshll.u32 %s638_s7, 4  ;;  %s309_s21 = int_to_ptr.vmem [resolvable:$true] %s308_s21 }
 0x170   : > { %s312_s19 = sadd.s32 6, %s1627_s23  ;;  %s641_s3 = scalar_lea.sflag %s1661_s13, 5 [#allocation3] }
 0x171   : > { %817 = dma.hbm_to_vmem [thread:$0]  (%p1946_p0), %s279_s26, 16, %s291_s4, %s633_s11 }
 0x172   : > { %p1947_p6 = pmov %p1946_p0  ;;  %p1948_p1 = pmov %p1946_p0 }
 0x173   : > { %s754_s18 = sshll.u32 %s1764_s14, 4  ;;  %s646_s12 = scalar_lea.vmem %s1648_s24, 6 [#allocation2] }
 0x174   : > { %s821_s2 = scalar_select %p1947_p6, [#allocation5], [#allocation48] }
 0x175   : > { %s1989_s19 = smov (!%p1948_p1, %s312_s19), 0  ;;  %s297_s27 = scalar_lea.hbm %s1893_s1, %s754_s18 }
 0x176   : > { %s1789_s17 = sld [smem:[%s821_s2 + %s1989_s19]]  ;;  %s1207_s20 = scalar_lea.hbm %s297_s27, 16 }
 0x177   : > { %p1208_p2 = scmp.ne.s32.totalorder %s297_s27, %s1207_s20  ;;  %p1949_p13 = pmov %p1946_p0 }
 0x178   : > { %p1212_p5 = scmp.lt.s32.totalorder %s297_s27, %s1893_s1  ;;  %p1213_p7 = scmp.lt.s32.totalorder %s1453_s25, %s1207_s20 }
 0x179   : > { %p1209_p3 = pnand %p1208_p2, %p1949_p13 }
 0x17a   : > { %p1214_p8 = por %p1213_p7, %p1212_p5 }
 0x17b   : > { %p1210_p9 = pneg %p1209_p3 }
 0x17d   : > { %p1215_p10 = pnand %p1214_p8, %p1210_p9 }
 0x17f   : > { %1218 = shalt.err (!%p1215_p10)  }
 0x180   : > { %s1219_s7 = scalar_lea.vmem %s309_s21, 16  ;;  %p1950_p11 = pmov %p1946_p0 }
 0x181   : > { %p1220_p4 = scmp.ne.s32.totalorder %s309_s21, %s1219_s7  ;;  %p1226_p6 = scmp.lt.s32.totalorder %s309_s21, %s1463_s9 }
 0x182   : > { %p1227_p1 = scmp.lt.s32.totalorder %s1466_s10, %s1219_s7 }
 0x183   : > { %p1221_p12 = pnand %p1220_p4, %p1950_p11 }
 0x184   : > { %p1228_p2 = por %p1227_p1, %p1226_p6 }
 0x185   : > { %p1222_p0 = pneg %p1221_p12 }
 0x187   : > { %p1229_p13 = pnand %p1228_p2, %p1222_p0 }
 0x189   : > { %1232 = shalt.err (!%p1229_p13)  }
 0x18a   : > { %p1951_p3 = pmov %p1950_p11  ;;  %s326_s26 = sshll.u32 %s646_s12, 4  ;;  %s327_s26 = int_to_ptr.vmem [resolvable:$true] %s326_s26 }
 0x18b   : > { %s330_s14 = sadd.s32 7, %s1627_s23  ;;  %s649_s19 = scalar_lea.sflag %s1661_s13, 6 [#allocation3] }
 0x18c   : > { %820 = dma.hbm_to_vmem [thread:$0]  (%p1951_p3), %s297_s27, 16, %s309_s21, %s641_s3 }
 0x18d   : > { %p1952_p9 = pmov %p1951_p3  ;;  %p1953_p5 = pmov %p1951_p3 }
 0x18e   : > { %s757_s18 = sshll.u32 %s1789_s17, 4  ;;  %s654_s30 = scalar_lea.vmem %s1648_s24, 7 [#allocation2] }
 0x18f   : > { %s824_s2 = scalar_select %p1952_p9, [#allocation5], [#allocation49] }
 0x190   : > { %s1991_s14 = smov (!%p1953_p5, %s330_s14), 0  ;;  %s315_s4 = scalar_lea.hbm %s1893_s1, %s757_s18 }
 0x191   : > { %s331_s11 = sld [smem:[%s824_s2 + %s1991_s14]]  ;;  %s1233_s7 = scalar_lea.hbm %s315_s4, 16 }
 0x192   : > { %p1234_p7 = scmp.ne.s32.totalorder %s315_s4, %s1233_s7  ;;  %p1954_p8 = pmov %p1951_p3 }
 0x193   : > { %p1238_p11 = scmp.lt.s32.totalorder %s315_s4, %s1893_s1  ;;  %p1239_p12 = scmp.lt.s32.totalorder %s1453_s25, %s1233_s7 }
 0x194   : > { %p1235_p10 = pnand %p1234_p7, %p1954_p8 }
 0x195   : > { %p1240_p0 = por %p1239_p12, %p1238_p11 }
 0x196   : > { %p1236_p4 = pneg %p1235_p10 }
 0x198   : > { %p1241_p6 = pnand %p1240_p0, %p1236_p4 }
 0x19a   : > { %1244 = shalt.err (!%p1241_p6)  }
 0x19b   : > { %s1245_s3 = scalar_lea.vmem %s327_s26, 16  ;;  %p1955_p2 = pmov %p1951_p3 }
 0x19c   : > { %p1246_p1 = scmp.ne.s32.totalorder %s327_s26, %s1245_s3  ;;  %p1252_p9 = scmp.lt.s32.totalorder %s327_s26, %s1463_s9 }
 0x19d   : > { %p1253_p5 = scmp.lt.s32.totalorder %s1466_s10, %s1245_s3 }
 0x19e   : > { %p1247_p13 = pnand %p1246_p1, %p1955_p2 }
 0x19f   : > { %p1254_p7 = por %p1253_p5, %p1252_p9 }
 0x1a0   : > { %p1248_p3 = pneg %p1247_p13 }
 0x1a2   : > { %p1255_p8 = pnand %p1254_p7, %p1248_p3 }
 0x1a4   : > { %1258 = shalt.err (!%p1255_p8)  }
 0x1a5   : > { %p1956_p10 = pmov %p1955_p2  ;;  %s344_s24 = sshll.u32 %s654_s30, 4  ;;  %s345_s24 = int_to_ptr.vmem [resolvable:$true] %s344_s24 }
 0x1a6   : > { %s657_s12 = scalar_lea.sflag %s1661_s13, 7 [#allocation3]  ;;  %s760_s27 = sshll.u32 %s331_s11, 4 }
 0x1a7   : > { %823 = dma.hbm_to_vmem [thread:$0]  (%p1956_p10), %s315_s4, 16, %s327_s26, %s649_s19 }
 0x1a8   : > { %s333_s2 = scalar_lea.hbm %s1893_s1, %s760_s27  ;;  %p1957_p11 = pmov %p1955_p2 }
 0x1a9   : > { %s1259_s18 = scalar_lea.hbm %s333_s2, 16  ;;  %p1264_p6 = scmp.lt.s32.totalorder %s333_s2, %s1893_s1 }
 0x1aa   : > { %p1260_p4 = scmp.ne.s32.totalorder %s333_s2, %s1259_s18  ;;  %p1265_p1 = scmp.lt.s32.totalorder %s1453_s25, %s1259_s18 }
 0x1ac   : > { %p1261_p12 = pnand %p1260_p4, %p1957_p11  ;;  %p1266_p2 = por %p1265_p1, %p1264_p6 }
 0x1ae   : > { %p1262_p0 = pneg %p1261_p12 }
 0x1b0   : > { %p1267_p13 = pnand %p1266_p2, %p1262_p0 }
 0x1b2   : > { %1270 = shalt.err (!%p1267_p13)  }
 0x1b3   : > { %s1271_s13 = scalar_lea.vmem %s345_s24, 16  ;;  %p1958_p9 = pmov %p1956_p10 }
 0x1b4   : > { %p1272_p3 = scmp.ne.s32.totalorder %s345_s24, %s1271_s13  ;;  %p1278_p8 = scmp.lt.s32.totalorder %s345_s24, %s1463_s9 }
 0x1b5   : > { %p1279_p10 = scmp.lt.s32.totalorder %s1466_s10, %s1271_s13 }
 0x1b6   : > { %p1273_p5 = pnand %p1272_p3, %p1958_p9 }
 0x1b7   : > { %p1280_p4 = por %p1279_p10, %p1278_p8 }
 0x1b8   : > { %p1274_p7 = pneg %p1273_p5 }
 0x1ba   : > { %p1281_p11 = pnand %p1280_p4, %p1274_p7 }
 0x1bc   : > { %1284 = shalt.err (!%p1281_p11)  }
 0x1bd   : > { %p1959_p12 = pmov %p1958_p9  ;;  %s51_s25 = scalar_lea.vmem [#allocation6], %s1419_s22 }
 0x1bf   : > { %826 = dma.hbm_to_vmem [thread:$0]  (%p1959_p12), %s333_s2, 16, %s345_s24, %s657_s12 }
 0x1c0   : > { %1325 = dma.done.wait %s1435_s5, 16 }
 0x1c1   : > { %1326 = vsyncadd %s1435_s5, 4294967280 }
 0x1c2   : > { %1327 = dma.done.wait %s1438_s6, 16 }
 0x1c3   : > { %1328 = vsyncadd %s1438_s6, 4294967280 }
 0x1c4   : > { %1329 = dma.done.wait %s1498_s16, 16 }
 0x1c5   : > { %1330 = vsyncadd %s1498_s16, 4294967280 }
 0x1c6   : > { %1331 = dma.done.wait %s1520_s8, 16 }
 0x1c7   : > { %1332 = vsyncadd %s1520_s8, 4294967280 }
 0x1c8   : > { %1333 = dma.done.wait %s1526_s29, 16 }
 0x1c9   : > { %1334 = vsyncadd %s1526_s29, 4294967280 }
 0x1ca   : > { %1335 = dma.done.wait %s1555_s28, 16 }
 0x1cb   : > { %1336 = vsyncadd %s1555_s28, 4294967280  ;;  %s1960_s22 = sld [smem:[#allocation67_spill]] }
 0x1d1   : > { %1337 = dma.done.wait %s1960_s22, 16 }
 0x1d2   : > { %1338 = vsyncadd %s1960_s22, 4294967280  ;;  %s1961_s5 = sld [smem:[#allocation68_spill]] }
 0x1d8   : > { %1339 = dma.done.wait %s1961_s5, 16 }
 0x1d9   : > { %1340 = vsyncadd %s1961_s5, 4294967280  ;;  %s1962_s6 = sld [smem:[#allocation62_spill]]  ;;  %s399_s26 = sshll.u32 %s51_s25, 4  ;;  %s400_s26 = int_to_ptr.vmem [resolvable:$true] %s399_s26 }
 0x1da   : > { %s1963_s9 = sld [smem:[#allocation66_spill]]  ;;  %s1285_s7 = scalar_lea.vmem %s400_s26, 128 }
 0x1db   : > { %s1964_s10 = sld [smem:[#allocation61_spill]]  ;;  %p1286_p0 = scmp.ne.s32.totalorder %s400_s26, %s1285_s7 }
 0x1dc   : > { %s1965_s16 = sld [smem:[#allocation64_spill]]  ;;  %s1359_s21 = smov [#allocation6]  }
 0x1dd   : > { %s1966_s30 = sld [smem:[#allocation69_spill]]  ;;  %s1289_s23 = sshll.u32 %s1359_s21, 4  ;;  %s1290_s23 = int_to_ptr.vmem [resolvable:$false] %s1289_s23 }
 0x1de   : > { %s1291_s3 = scalar_lea.vmem %s1290_s23, 256  ;;  %p1292_p13 = scmp.lt.s32.totalorder %s400_s26, %s1290_s23 }
 0x1df   : > { %s772_s8 = sshll.u32 %s1962_s6, 7  ;;  %p1293_p3 = scmp.lt.s32.totalorder %s1291_s3, %s1285_s7 }
 0x1e0   : > { %v382_v0 = vld [vmem:[%s1963_s9] sm:$0xff] }
 0x1e1   : > { %v383_v1 = vmul.f32 10.0, %v382_v0  ;;  %s1967_s4 = sand.u32 1, %s1964_s10   ;;  %p1294_p9 = por %p1293_p3, %p1292_p13 }
 0x1e2   : > { %s386_s11 = scalar_lea.sflag [#allocation7], %s1967_s4  ;;  %p1968_p6 = scmp.ne.s32.totalorder %s1965_s16, 0 }
 0x1e3   : > { %s397_s28 = scalar_lea.hbm %s1966_s30, %s772_s8  ;;  %384 = vst [vmem:[%s51_s25] sm:$0xff] %v383_v1 }
 0x1e4   : > { %p1287_p1 = pnand %p1286_p0, %p1968_p6 }
 0x1e6   : > { %p1288_p2 = pneg %p1287_p1 }
 0x1e8   : > { %p1295_p5 = pnand %p1294_p9, %p1288_p2 }
 0x1ea   : > { %1298 = shalt.err (!%p1295_p5)
}
 0x1eb   : > { %s1299_s24 = scalar_lea.hbm %s397_s28, 128  ;;  %s1303_s17 = scalar_lea.hbm %s1966_s30, 1024 }
 0x1ec   : > { %p1300_p7 = scmp.ne.s32.totalorder %s397_s28, %s1299_s24  ;;  %p1304_p4 = scmp.lt.s32.totalorder %s397_s28, %s1966_s30 }
 0x1ed   : > { %p1305_p11 = scmp.lt.s32.totalorder %s1303_s17, %s1299_s24 }
 0x1ee   : > { %p1301_p8 = pnand %p1300_p7, %p1968_p6 }
 0x1ef   : > { %p1306_p12 = por %p1305_p11, %p1304_p4 }
 0x1f0   : > { %p1302_p10 = pneg %p1301_p8 }
 0x1f2   : > { %p1307_p0 = pnand %p1306_p12, %p1302_p10 }
 0x1f4   : > { %1310 = shalt.err (!%p1307_p0)
}
 0x1f5   : > { %827 = dma.vmem_to_hbm [thread:$0]  (%p1968_p6), %s400_s26, 128, %s397_s28, %s386_s11  }
 0x1f6 PF: > { %s1969_s18 = sld [smem:[#allocation62_spill]] }
 0x1f7   : > { %s1970_s0 = sld [smem:[#allocation60_spill]] }
 0x1f8   : > { %s1971_s20 = sld [smem:[#allocation65_spill]] }
 0x1fc   : > { %p835_p1 = scmp.ge.s32.totalorder %s1969_s18, 1 }
 0x1fd   : > { %s411_s13 = sand.u32 1, %s1970_s0  }
 0x1fe   : > { %p1972_p2 = scmp.ne.s32.totalorder %s1971_s20, 0  ;;  %s412_s25 = scalar_lea.sflag [#allocation7], %s411_s13 }
 0x200   : > { %p830_p13 = pnand %p835_p1, %p1972_p2 }
 0x202   : > { %p831_p3 = pneg %p830_p13 }
 0x204   : > { %1342 = dma.done.wait (%p831_p3), %s412_s25, 128  }
 0x205   : > { %1344 = vsyncadd (%p831_p3), %s412_s25, 4294967168  ;;  %s1973_s12 = sld [smem:[#allocation61_spill]]  ;;  %p16_p9 = scmp.ge.s32.totalorder %s1395_s15, 9  }
 0x206   : > { %s1974_s13 = sld [smem:[#allocation63_spill]]  ;;  %s1975_s14 = smov %s1395_s15 }
 0x207   :  { %18 = sbr.rel (!%p16_p9) target bundleno = 9 (0x9), region = 188 }
 0x20c   :  { %417 = vsyncpa [#allocation7], 1 }
 0x20d   :  { %419 = vsyncpa [#allocation7 + $0x1], 1 }
 0x20e   :  { %420 = vsyncmov [#allocation3] }
 0x211   :  { %s421_s22 = vpop.sfrf %420 }
 0x212   :  { %p775_p6 = scmp.ne.s32.totalorder %s421_s22, 0 }
 0x214   :  { %425 = shalt.err (%p775_p6)  }
 0x215   :  { %427 = vsyncmov [#allocation3 + $0x1] }
 0x218   :  { %s428_s5 = vpop.sfrf %427 }
 0x219   :  { %p776_p5 = scmp.ne.s32.totalorder %s428_s5, 0 }
 0x21b   :  { %432 = shalt.err (%p776_p5)  }
 0x21c   :  { %434 = vsyncmov [#allocation3 + $0x2] }
 0x21f   :  { %s435_s6 = vpop.sfrf %434 }
 0x220   :  { %p777_p7 = scmp.ne.s32.totalorder %s435_s6, 0 }
 0x222   :  { %439 = shalt.err (%p777_p7)  }
 0x223   :  { %441 = vsyncmov [#allocation3 + $0x3] }
 0x226   :  { %s442_s9 = vpop.sfrf %441 }
 0x227   :  { %p778_p8 = scmp.ne.s32.totalorder %s442_s9, 0 }
 0x229   :  { %446 = shalt.err (%p778_p8)  }
 0x22a   :  { %448 = vsyncmov [#allocation3 + $0x4] }
 0x22d   :  { %s449_s15 = vpop.sfrf %448 }
 0x22e   :  { %p779_p10 = scmp.ne.s32.totalorder %s449_s15, 0 }
 0x230   :  { %453 = shalt.err (%p779_p10)  }
 0x231   :  { %455 = vsyncmov [#allocation3 + $0x5] }
 0x234   :  { %s456_s1 = vpop.sfrf %455 }
 0x235   :  { %p780_p4 = scmp.ne.s32.totalorder %s456_s1, 0 }
 0x237   :  { %460 = shalt.err (%p780_p4)  }
 0x238   :  { %462 = vsyncmov [#allocation3 + $0x6] }
 0x23b   :  { %s463_s10 = vpop.sfrf %462 }
 0x23c   :  { %p781_p11 = scmp.ne.s32.totalorder %s463_s10, 0 }
 0x23e   :  { %467 = shalt.err (%p781_p11)  }
 0x23f   :  { %469 = vsyncmov [#allocation3 + $0x7] }
 0x242   :  { %s470_s16 = vpop.sfrf %469 }
 0x243   :  { %p782_p12 = scmp.ne.s32.totalorder %s470_s16, 0 }
 0x245   :  { %474 = shalt.err (%p782_p12)  }
 0x246   :  { %476 = vsyncmov [#allocation3 + $0x8] }
 0x249   :  { %s477_s8 = vpop.sfrf %476 }
 0x24a   :  { %p783_p0 = scmp.ne.s32.totalorder %s477_s8, 0 }
 0x24c   :  { %481 = shalt.err (%p783_p0)  }
 0x24d   :  { %483 = vsyncmov [#allocation3 + $0x9] }
 0x250   :  { %s484_s26 = vpop.sfrf %483 }
 0x251   :  { %p784_p1 = scmp.ne.s32.totalorder %s484_s26, 0 }
 0x253   :  { %488 = shalt.err (%p784_p1)  }
 0x254   :  { %490 = vsyncmov [#allocation3 + $0xa] }
 0x257   :  { %s491_s29 = vpop.sfrf %490 }
 0x258   :  { %p785_p2 = scmp.ne.s32.totalorder %s491_s29, 0 }
 0x25a   :  { %495 = shalt.err (%p785_p2)  }
 0x25b   :  { %497 = vsyncmov [#allocation3 + $0xb] }
 0x25e   :  { %s498_s19 = vpop.sfrf %497 }
 0x25f   :  { %p786_p13 = scmp.ne.s32.totalorder %s498_s19, 0 }
 0x261   :  { %502 = shalt.err (%p786_p13)  }
 0x262   :  { %504 = vsyncmov [#allocation3 + $0xc] }
 0x265   :  { %s505_s30 = vpop.sfrf %504 }
 0x266   :  { %p787_p3 = scmp.ne.s32.totalorder %s505_s30, 0 }
 0x268   :  { %509 = shalt.err (%p787_p3)  }
 0x269   :  { %511 = vsyncmov [#allocation3 + $0xd] }
 0x26c   :  { %s512_s28 = vpop.sfrf %511 }
 0x26d   :  { %p788_p9 = scmp.ne.s32.totalorder %s512_s28, 0 }
 0x26f   :  { %516 = shalt.err (%p788_p9)  }
 0x270   :  { %518 = vsyncmov [#allocation3 + $0xe] }
 0x273   :  { %s519_s4 = vpop.sfrf %518 }
 0x274   :  { %p789_p6 = scmp.ne.s32.totalorder %s519_s4, 0 }
 0x276   :  { %523 = shalt.err (%p789_p6)  }
 0x277   :  { %525 = vsyncmov [#allocation3 + $0xf] }
 0x27a   :  { %s526_s11 = vpop.sfrf %525 }
 0x27b   :  { %p790_p5 = scmp.ne.s32.totalorder %s526_s11, 0 }
 0x27d   :  { %530 = shalt.err (%p790_p5)  }

</bundles_post_ra>
